<compile_context>
chip_gen: v7x
topology: tpu7x:2x2x1
jax: 0.10.0
libtpu: 0.0.40
codegen_flags: <defaults>
</compile_context>

<pallas_src>
import numpy as np
import jax
import jax.numpy as jnp
from jax.experimental import pallas as pl
from jax.experimental.pallas import tpu as pltpu


# ---------------------------------------------------------------------------
# Kernel
# ---------------------------------------------------------------------------
def dual_basic_block_kernel(
    x_ref,                        # (B, H, W*C)  input block (also the residual)
    c1u_ref, c1c_ref, c1d_ref,    # (W*C, W*C)   conv1 banded blocks for dy=-1/0/+1
    bn1s_ref, bn1b_ref,           # (1, W*C)     folded BN1 scale / bias
    wmask_ref,                    # (W*C, W)     GC conv_mask (logits matmul)
    expw_ref,                     # (W, W*C)     per-pixel scalar -> per-(pixel,chan) lanes
    wg1_ref, bg1_ref,             # (W*C, Cr), (1, Cr)   GC channel_add_conv[0]
    lng_ref, lnb_ref,             # (1, Cr)      GC LayerNorm gamma / beta
    wg2_ref, bg2_ref,             # (Cr, W*C), (1, W*C)  GC channel_add_conv[3]
    c2u_ref, c2c_ref, c2d_ref,    # (W*C, W*C)   conv2 banded blocks
    bn2s_ref, bn2b_ref,           # (1, W*C)     folded BN2 scale / bias
    wse1_ref, wse2_ref,           # (W*C, Cse), (Cse, W*C)  SE fc1 / fc2
    out_ref,                      # (B, H, W*C)
):
    B, H, WC = out_ref.shape
    BH = B * H
    W = wmask_ref.shape[1]
    f32 = jnp.float32

    x3 = x_ref[...].astype(f32)                       # (B, H, WC)
    x2d = x3.reshape(BH, WC)                          # free: merge leading dims

    # Per-image SAME-padding masks for the dy row shifts (h index inside image).
    h_in = jax.lax.broadcasted_iota(jnp.int32, (B, H, WC), 1).reshape(BH, WC)
    not_top = h_in != 0
    not_bot = h_in != (H - 1)

    def conv3x3(a, wu_ref, wc_ref, wd_ref):
        # dy = -1 / +1 row shifts via sublane roll + boundary mask (XLU/VPU),
        # then three accumulating K=WC dots -- no im2col materialization.
        up = jnp.where(not_top, pltpu.roll(a, 1, 0), 0.0)        # a[r-1]
        dn = jnp.where(not_bot, pltpu.roll(a, BH - 1, 0), 0.0)   # a[r+1]
        acc = jnp.dot(a, wc_ref[...], preferred_element_type=f32)
        acc = acc + jnp.dot(up, wu_ref[...], preferred_element_type=f32)
        acc = acc + jnp.dot(dn, wd_ref[...], preferred_element_type=f32)
        return acc

    # ---- conv1 (3x3, stride 1, pad 1) + folded BN1 + ReLU ----
    out1 = jnp.maximum(
        conv3x3(x2d, c1u_ref, c1c_ref, c1d_ref) * bn1s_ref[...] + bn1b_ref[...],
        0.0)                                          # (BH, WC)
    out1_3 = out1.reshape(B, H, WC)

    # ---- GC ContextBlock: attention pool + channel_add (batched over B) ----
    # logits[row, w] = sum_c out1[row, w*C + c] * wm[c]
    # (conv_mask bias dropped: a per-image constant cancels in the softmax)
    logits = jnp.dot(out1, wmask_ref[...], preferred_element_type=f32)    # (BH, W)
    lg3 = logits.reshape(B, H, W)
    mmax = jnp.max(lg3, axis=(1, 2), keepdims=True)                       # (B,1,1)
    e3 = jnp.exp(lg3 - mmax)
    denom = jnp.sum(e3, axis=(1, 2), keepdims=True).reshape(B, 1)         # (B,1)
    e_exp = jnp.dot(e3.reshape(BH, W), expw_ref[...],
                    preferred_element_type=f32)                           # (BH, WC)
    wsum = jnp.sum((out1 * e_exp).reshape(B, H, WC), axis=1)              # (B, WC)
    # t = context @ wg1 + bg1, with context[c] = (sum_w wsum[w*C+c]) / denom
    t = jnp.dot(wsum, wg1_ref[...], preferred_element_type=f32) / denom + bg1_ref[...]
    mu = jnp.mean(t, axis=-1, keepdims=True)
    var = jnp.mean((t - mu) ** 2, axis=-1, keepdims=True)
    t = (t - mu) * jax.lax.rsqrt(var + 1e-5) * lng_ref[...] + lnb_ref[...]
    t = jnp.maximum(t, 0.0)
    add_t = jnp.dot(t, wg2_ref[...], preferred_element_type=f32) + bg2_ref[...]   # (B, WC)
    out_gc = (out1_3 + add_t[:, None, :]).reshape(BH, WC)

    # ---- conv2 (3x3, pad 1) + folded BN2 ----
    out2 = conv3x3(out_gc, c2u_ref, c2c_ref, c2d_ref) * bn2s_ref[...] + bn2b_ref[...]
    out2_3 = out2.reshape(B, H, WC)

    # ---- SE gate + residual + ReLU (batched), written straight to out_ref ----
    colmean = jnp.mean(out2_3, axis=1)                                    # (B, WC)
    h1 = jnp.maximum(
        jnp.dot(colmean, wse1_ref[...], preferred_element_type=f32) * (1.0 / W),
        0.0)                                                              # (B, Cse)
    gate = jax.nn.sigmoid(
        jnp.dot(h1, wse2_ref[...], preferred_element_type=f32))           # (B, WC)
    out_ref[...] = jnp.maximum(out2_3 * gate[:, None, :] + x3, 0.0).astype(out_ref.dtype)


# ---------------------------------------------------------------------------
# One-time host-side weight folding (hoisted out of the forward call)
# ---------------------------------------------------------------------------
def fold_params(params, H, W, C):
    WC = W * C
    f32 = jnp.float32

    def dy_block(wconv, dy):
        # (WC, WC) banded block for row-offset dy: folds the kx shifts, the
        # zero padding along W and the per-tap (C, C) weights.
        m = jnp.zeros((WC, WC), f32)
        for dx in (-1, 0, 1):
            shift = np.diag(np.ones(W - abs(dx), np.float32), -dx)   # [w+dx, w] = 1
            m = m + jnp.kron(jnp.asarray(shift), wconv[dy + 1, dx + 1].astype(f32))
        return m

    def tile_lane(v):                                 # per-channel (C,) -> (1, W*C)
        return jnp.tile(jnp.reshape(v, (1, C)).astype(f32), (1, W))

    return dict(
        c1u=dy_block(params["w1"], -1),
        c1c=dy_block(params["w1"], 0),
        c1d=dy_block(params["w1"], 1),
        bn1s=tile_lane(params["bn1_scale"]), bn1b=tile_lane(params["bn1_bias"]),
        wmask=jnp.kron(jnp.eye(W, dtype=f32), params["wm"].astype(f32)),      # (WC, W)
        expw=jnp.kron(jnp.eye(W, dtype=f32), jnp.ones((1, C), f32)),          # (W, WC)
        wg1=jnp.tile(params["wg1"].astype(f32), (W, 1)),                      # (WC, Cr)
        bg1=params["bg1"].astype(f32),
        lng=params["ln_g"].astype(f32), lnb=params["ln_b"].astype(f32),
        wg2=jnp.tile(params["wg2"].astype(f32), (1, W)),                      # (Cr, WC)
        bg2=tile_lane(params["bg2"]),
        c2u=dy_block(params["w2"], -1),
        c2c=dy_block(params["w2"], 0),
        c2d=dy_block(params["w2"], 1),
        bn2s=tile_lane(params["bn2_scale"]), bn2b=tile_lane(params["bn2_bias"]),
        wse1=jnp.tile(params["wse1"].astype(f32), (W, 1)),                    # (WC, Cse)
        wse2=jnp.tile(params["wse2"].astype(f32), (1, W)),                    # (Cse, WC)
    )


_PARAM_ORDER = (
    "c1u", "c1c", "c1d", "bn1s", "bn1b",
    "wmask", "expw",
    "wg1", "bg1", "lng", "lnb", "wg2", "bg2",
    "c2u", "c2c", "c2d", "bn2s", "bn2b",
    "wse1", "wse2",
)


# ---------------------------------------------------------------------------
# Wrapper
# ---------------------------------------------------------------------------
def dual_basic_block(x, folded, *, block_batch=None):
    """x: (N, H, W, C) float32 NHWC.  folded: output of fold_params()."""
    N, H, W, C = x.shape
    WC = W * C

    if block_batch is None:
        # >= 2 grid steps (keeps both v7x TensorCores busy and lets the
        # BlockSpec pipeline overlap x/out HBM traffic with compute), while
        # amortizing per-step overhead for larger N.
        B = 1
        for cand in (8, 4, 2):
            if N % cand == 0 and N // cand >= 2:
                B = cand
                break
        if N // B < 2:
            B = N
    else:
        B = block_batch
    assert N % B == 0

    params = [folded[k] for k in _PARAM_ORDER]

    def full_spec(a):
        nd = a.ndim
        return pl.BlockSpec(a.shape, lambda n, _nd=nd: (0,) * _nd)

    in_specs = [pl.BlockSpec((B, H, WC), lambda n: (n, 0, 0))]
    in_specs += [full_spec(a) for a in params]
    out_spec = pl.BlockSpec((B, H, WC), lambda n: (n, 0, 0))

    x_r = x.reshape(N, H, WC)                         # free contiguous reshape

    out = pl.pallas_call(
        dual_basic_block_kernel,
        out_shape=jax.ShapeDtypeStruct((N, H, WC), x.dtype),
        grid_spec=pltpu.PrefetchScalarGridSpec(
            num_scalar_prefetch=0,
            grid=(N // B,),
            in_specs=in_specs,
            out_specs=out_spec,
        ),
        compiler_params=pltpu.CompilerParams(
            dimension_semantics=("parallel",)),
    )(x_r, *params)

    return out.reshape(N, H, W, C)


# ---------------------------------------------------------------------------
# Parameters + pure-JAX reference (eval-mode forward, NHWC)
# ---------------------------------------------------------------------------
def init_params(key, C, gc_ratio=4, se_reduction=4):
    Cr = max(C // gc_ratio, 1)
    Cse = max(C // se_reduction, 1)
    ks = jax.random.split(key, 24)

    def fold_bn(kg, kb, km, kv):
        g = jax.random.uniform(kg, (C,), minval=0.5, maxval=1.5)
        b = jax.random.normal(kb, (C,)) * 0.1
        m = jax.random.normal(km, (C,)) * 0.1
        v = jax.random.uniform(kv, (C,), minval=0.5, maxval=1.5)
        s = g / jnp.sqrt(v + 1e-5)
        return s.reshape(1, C), (b - m * s).reshape(1, C)

    bn1s, bn1b = fold_bn(ks[0], ks[1], ks[2], ks[3])
    bn2s, bn2b = fold_bn(ks[4], ks[5], ks[6], ks[7])
    return dict(
        w1=jax.random.normal(ks[8], (3, 3, C, C), jnp.float32) * 0.2,
        bn1_scale=bn1s, bn1_bias=bn1b,
        wm=jax.random.normal(ks[9], (C, 1), jnp.float32) * 0.3,
        bm=jax.random.normal(ks[10], (1, 1), jnp.float32) * 0.1,
        wg1=jax.random.normal(ks[11], (C, Cr), jnp.float32) * 0.3,
        bg1=jax.random.normal(ks[12], (1, Cr), jnp.float32) * 0.1,
        ln_g=jax.random.uniform(ks[13], (1, Cr), minval=0.5, maxval=1.5),
        ln_b=jax.random.normal(ks[14], (1, Cr)) * 0.1,
        wg2=jax.random.normal(ks[15], (Cr, C), jnp.float32) * 0.3,
        bg2=jax.random.normal(ks[16], (1, C), jnp.float32) * 0.1,
        w2=jax.random.normal(ks[17], (3, 3, C, C), jnp.float32) * 0.2,
        bn2_scale=bn2s, bn2_bias=bn2b,
        wse1=jax.random.normal(ks[18], (C, Cse), jnp.float32) * 0.3,
        wse2=jax.random.normal(ks[19], (Cse, C), jnp.float32) * 0.3,
    )


def reference_forward(x, p):
    """Pure-JAX reference of the same (eval-mode) forward pass (NHWC)."""
    def conv3x3(z, w):
        return jax.lax.conv_general_dilated(
            z, w, (1, 1), 'SAME', dimension_numbers=('NHWC', 'HWIO', 'NHWC'))

    N, H, W, C = x.shape
    out = jnp.maximum(conv3x3(x, p["w1"]) * p["bn1_scale"] + p["bn1_bias"], 0.)
    # GC ContextBlock
    logits = jnp.einsum('nhwc,co->nhwo', out, p["wm"])[..., 0] + p["bm"][0, 0]
    attn = jax.nn.softmax(logits.reshape(N, -1), axis=-1).reshape(N, H, W)
    ctx = jnp.einsum('nhwc,nhw->nc', out, attn)
    t = ctx @ p["wg1"] + p["bg1"]
    mu = t.mean(-1, keepdims=True)
    var = ((t - mu) ** 2).mean(-1, keepdims=True)
    t = (t - mu) / jnp.sqrt(var + 1e-5) * p["ln_g"] + p["ln_b"]
    t = jnp.maximum(t, 0.)
    out = out + (t @ p["wg2"] + p["bg2"])[:, None, None, :]
    out = conv3x3(out, p["w2"]) * p["bn2_scale"] + p["bn2_bias"]
    # SE
    s = out.mean(axis=(1, 2))
    gate = jax.nn.sigmoid(jnp.maximum(s @ p["wse1"], 0.) @ p["wse2"])
    out = out * gate[:, None, None, :]
    return jnp.maximum(out + x, 0.)


if __name__ == "__main__":
    # PyTorch-equivalent input would be NCHW (2, 8, 16, 16); kernel uses NHWC.
    N, H, W, C = 2, 16, 16, 8
    key = jax.random.PRNGKey(0)
    kx, kp = jax.random.split(key)
    x = jax.random.normal(kx, (N, H, W, C), jnp.float32)
    params = init_params(kp, C)

    folded = fold_params(params, H, W, C)       # one-time host-side folding

    fwd = jax.jit(dual_basic_block)
    out = jax.block_until_ready(fwd(x, folded))

    ref = reference_forward(x, params)
    assert out.shape == (N, H, W, C)
    np.testing.assert_allclose(np.asarray(out), np.asarray(ref),
                               atol=3e-3, rtol=3e-3)
    print("KERNEL_OK")
</pallas_src>

<mosaic_0001>
module attributes {stable_mosaic.version = 11 : i64} {
  func.func @dual_basic_block_kernel(%arg0: i32, %arg1: memref<1x16x128xf32, #tpu.memory_space<vmem>>, %arg2: memref<128x128xf32, #tpu.memory_space<vmem>>, %arg3: memref<128x128xf32, #tpu.memory_space<vmem>>, %arg4: memref<128x128xf32, #tpu.memory_space<vmem>>, %arg5: memref<1x128xf32, #tpu.memory_space<vmem>>, %arg6: memref<1x128xf32, #tpu.memory_space<vmem>>, %arg7: memref<128x16xf32, #tpu.memory_space<vmem>>, %arg8: memref<16x128xf32, #tpu.memory_space<vmem>>, %arg9: memref<128x2xf32, #tpu.memory_space<vmem>>, %arg10: memref<1x2xf32, #tpu.memory_space<vmem>>, %arg11: memref<1x2xf32, #tpu.memory_space<vmem>>, %arg12: memref<1x2xf32, #tpu.memory_space<vmem>>, %arg13: memref<2x128xf32, #tpu.memory_space<vmem>>, %arg14: memref<1x128xf32, #tpu.memory_space<vmem>>, %arg15: memref<128x128xf32, #tpu.memory_space<vmem>>, %arg16: memref<128x128xf32, #tpu.memory_space<vmem>>, %arg17: memref<128x128xf32, #tpu.memory_space<vmem>>, %arg18: memref<1x128xf32, #tpu.memory_space<vmem>>, %arg19: memref<1x128xf32, #tpu.memory_space<vmem>>, %arg20: memref<128x2xf32, #tpu.memory_space<vmem>>, %arg21: memref<2x128xf32, #tpu.memory_space<vmem>>, %arg22: memref<1x16x128xf32, #tpu.memory_space<vmem>>) attributes {dimension_semantics = [#tpu.dimension_semantics<parallel>], iteration_bounds = array<i64: 2>, scalar_prefetch = 0 : i64, scratch_operands = 0 : i64, tpu.core_type = #tpu.core_type<tc>, window_params = [{transform_indices = @transform_0, window_bounds = array<i64: 1, 16, 128>}, {pipeline_mode = #tpu.pipeline_mode<synchronous>, transform_indices = @transform_1, window_bounds = array<i64: 128, 128>}, {pipeline_mode = #tpu.pipeline_mode<synchronous>, transform_indices = @transform_2, window_bounds = array<i64: 128, 128>}, {pipeline_mode = #tpu.pipeline_mode<synchronous>, transform_indices = @transform_3, window_bounds = array<i64: 128, 128>}, {pipeline_mode = #tpu.pipeline_mode<synchronous>, transform_indices = @transform_4, window_bounds = array<i64: 1, 128>}, {pipeline_mode = #tpu.pipeline_mode<synchronous>, transform_indices = @transform_5, window_bounds = array<i64: 1, 128>}, {pipeline_mode = #tpu.pipeline_mode<synchronous>, transform_indices = @transform_6, window_bounds = array<i64: 128, 16>}, {pipeline_mode = #tpu.pipeline_mode<synchronous>, transform_indices = @transform_7, window_bounds = array<i64: 16, 128>}, {pipeline_mode = #tpu.pipeline_mode<synchronous>, transform_indices = @transform_8, window_bounds = array<i64: 128, 2>}, {pipeline_mode = #tpu.pipeline_mode<synchronous>, transform_indices = @transform_9, window_bounds = array<i64: 1, 2>}, {pipeline_mode = #tpu.pipeline_mode<synchronous>, transform_indices = @transform_10, window_bounds = array<i64: 1, 2>}, {pipeline_mode = #tpu.pipeline_mode<synchronous>, transform_indices = @transform_11, window_bounds = array<i64: 1, 2>}, {pipeline_mode = #tpu.pipeline_mode<synchronous>, transform_indices = @transform_12, window_bounds = array<i64: 2, 128>}, {pipeline_mode = #tpu.pipeline_mode<synchronous>, transform_indices = @transform_13, window_bounds = array<i64: 1, 128>}, {pipeline_mode = #tpu.pipeline_mode<synchronous>, transform_indices = @transform_14, window_bounds = array<i64: 128, 128>}, {pipeline_mode = #tpu.pipeline_mode<synchronous>, transform_indices = @transform_15, window_bounds = array<i64: 128, 128>}, {pipeline_mode = #tpu.pipeline_mode<synchronous>, transform_indices = @transform_16, window_bounds = array<i64: 128, 128>}, {pipeline_mode = #tpu.pipeline_mode<synchronous>, transform_indices = @transform_17, window_bounds = array<i64: 1, 128>}, {pipeline_mode = #tpu.pipeline_mode<synchronous>, transform_indices = @transform_18, window_bounds = array<i64: 1, 128>}, {pipeline_mode = #tpu.pipeline_mode<synchronous>, transform_indices = @transform_19, window_bounds = array<i64: 128, 2>}, {pipeline_mode = #tpu.pipeline_mode<synchronous>, transform_indices = @transform_20, window_bounds = array<i64: 2, 128>}, {transform_indices = @transform_21, window_bounds = array<i64: 1, 16, 128>}]} {
    %c0 = arith.constant 0 : index
    %c0_0 = arith.constant 0 : index
    %c0_1 = arith.constant 0 : index
    %0 = vector.load %arg1[%c0, %c0_0, %c0_1] : memref<1x16x128xf32, #tpu.memory_space<vmem>>, vector<1x16x128xf32>
    %1 = vector.shape_cast %0 : vector<1x16x128xf32> to vector<16x128xf32>
    %2 = tpu.iota {dimensions = array<i32: 1>} : vector<1x16x128xi32>
    %3 = vector.shape_cast %2 : vector<1x16x128xi32> to vector<16x128xi32>
    %c0_i32 = arith.constant 0 : i32
    %4 = vector.broadcast %c0_i32 : i32 to vector<16x128xi32>
    %5 = arith.cmpi ne, %3, %4 : vector<16x128xi32>
    %c15_i32 = arith.constant 15 : i32
    %6 = vector.broadcast %c15_i32 : i32 to vector<16x128xi32>
    %7 = arith.cmpi ne, %3, %6 : vector<16x128xi32>
    %c1_i32 = arith.constant 1 : i32
    %8 = tpu.dynamic_rotate %1 by %c1_i32 dim 0 : vector<16x128xf32>, i32 -> vector<16x128xf32>
    %cst = arith.constant 0.000000e+00 : f32
    %9 = vector.broadcast %cst : f32 to vector<16x128xf32>
    %10 = arith.select %5, %8, %9 : vector<16x128xi1>, vector<16x128xf32>
    %c15_i32_2 = arith.constant 15 : i32
    %11 = tpu.dynamic_rotate %1 by %c15_i32_2 dim 0 : vector<16x128xf32>, i32 -> vector<16x128xf32>
    %cst_3 = arith.constant 0.000000e+00 : f32
    %12 = vector.broadcast %cst_3 : f32 to vector<16x128xf32>
    %13 = arith.select %7, %11, %12 : vector<16x128xi1>, vector<16x128xf32>
    %c0_4 = arith.constant 0 : index
    %c0_5 = arith.constant 0 : index
    %14 = vector.load %arg3[%c0_4, %c0_5] : memref<128x128xf32, #tpu.memory_space<vmem>>, vector<128x128xf32>
    %cst_6 = arith.constant dense<0.000000e+00> : vector<16x128xf32>
    %15 = tpu.matmul %1, %14, %cst_6 {dimension_numbers = #tpu.dot_dimension_numbers<[1], [0], [0], [1], [0, 0, 1, 1], [], []>} : vector<16x128xf32>, vector<128x128xf32>, vector<16x128xf32> -> vector<16x128xf32>
    %c0_7 = arith.constant 0 : index
    %c0_8 = arith.constant 0 : index
    %16 = vector.load %arg2[%c0_7, %c0_8] : memref<128x128xf32, #tpu.memory_space<vmem>>, vector<128x128xf32>
    %cst_9 = arith.constant dense<0.000000e+00> : vector<16x128xf32>
    %17 = tpu.matmul %10, %16, %cst_9 {dimension_numbers = #tpu.dot_dimension_numbers<[1], [0], [0], [1], [0, 0, 1, 1], [], []>} : vector<16x128xf32>, vector<128x128xf32>, vector<16x128xf32> -> vector<16x128xf32>
    %18 = arith.addf %15, %17 : vector<16x128xf32>
    %c0_10 = arith.constant 0 : index
    %c0_11 = arith.constant 0 : index
    %19 = vector.load %arg4[%c0_10, %c0_11] : memref<128x128xf32, #tpu.memory_space<vmem>>, vector<128x128xf32>
    %cst_12 = arith.constant dense<0.000000e+00> : vector<16x128xf32>
    %20 = tpu.matmul %13, %19, %cst_12 {dimension_numbers = #tpu.dot_dimension_numbers<[1], [0], [0], [1], [0, 0, 1, 1], [], []>} : vector<16x128xf32>, vector<128x128xf32>, vector<16x128xf32> -> vector<16x128xf32>
    %21 = arith.addf %18, %20 : vector<16x128xf32>
    %c0_13 = arith.constant 0 : index
    %c0_14 = arith.constant 0 : index
    %22 = vector.load %arg5[%c0_13, %c0_14] : memref<1x128xf32, #tpu.memory_space<vmem>>, vector<1x128xf32>
    %23 = vector.broadcast %22 : vector<1x128xf32> to vector<16x128xf32>
    %24 = arith.mulf %21, %23 : vector<16x128xf32>
    %c0_15 = arith.constant 0 : index
    %c0_16 = arith.constant 0 : index
    %25 = vector.load %arg6[%c0_15, %c0_16] : memref<1x128xf32, #tpu.memory_space<vmem>>, vector<1x128xf32>
    %26 = vector.broadcast %25 : vector<1x128xf32> to vector<16x128xf32>
    %27 = arith.addf %24, %26 : vector<16x128xf32>
    %cst_17 = arith.constant 0.000000e+00 : f32
    %28 = vector.broadcast %cst_17 : f32 to vector<16x128xf32>
    %29 = arith.maximumf %27, %28 : vector<16x128xf32>
    %30 = vector.shape_cast %29 : vector<16x128xf32> to vector<1x16x128xf32>
    %c0_18 = arith.constant 0 : index
    %c0_19 = arith.constant 0 : index
    %31 = vector.load %arg7[%c0_18, %c0_19] : memref<128x16xf32, #tpu.memory_space<vmem>>, vector<128x16xf32>
    %cst_20 = arith.constant dense<0.000000e+00> : vector<16x16xf32>
    %32 = tpu.matmul %29, %31, %cst_20 {dimension_numbers = #tpu.dot_dimension_numbers<[1], [0], [0], [1], [0, 0, 1, 1], [], []>} : vector<16x128xf32>, vector<128x16xf32>, vector<16x16xf32> -> vector<16x16xf32>
    %33 = vector.shape_cast %32 : vector<16x16xf32> to vector<1x16x16xf32>
    %cst_21 = arith.constant dense<0xFF800000> : vector<1xf32>
    %34 = vector.multi_reduction <maximumf>, %33, %cst_21 [1, 2] : vector<1x16x16xf32> to vector<1xf32>
    %35 = vector.shape_cast %34 : vector<1xf32> to vector<1x1x1xf32>
    %36 = vector.broadcast %35 : vector<1x1x1xf32> to vector<1x16x16xf32>
    %37 = arith.subf %33, %36 : vector<1x16x16xf32>
    %38 = math.exp %37 : vector<1x16x16xf32>
    %cst_22 = arith.constant dense<0.000000e+00> : vector<1xf32>
    %39 = vector.multi_reduction <add>, %38, %cst_22 [1, 2] : vector<1x16x16xf32> to vector<1xf32>
    %40 = vector.shape_cast %39 : vector<1xf32> to vector<1x1x1xf32>
    %41 = vector.shape_cast %40 : vector<1x1x1xf32> to vector<1x1xf32>
    %42 = vector.shape_cast %38 : vector<1x16x16xf32> to vector<16x16xf32>
    %c0_23 = arith.constant 0 : index
    %c0_24 = arith.constant 0 : index
    %43 = vector.load %arg8[%c0_23, %c0_24] : memref<16x128xf32, #tpu.memory_space<vmem>>, vector<16x128xf32>
    %cst_25 = arith.constant dense<0.000000e+00> : vector<16x128xf32>
    %44 = tpu.matmul %42, %43, %cst_25 {dimension_numbers = #tpu.dot_dimension_numbers<[1], [0], [0], [1], [0, 0, 1, 1], [], []>} : vector<16x16xf32>, vector<16x128xf32>, vector<16x128xf32> -> vector<16x128xf32>
    %45 = arith.mulf %29, %44 : vector<16x128xf32>
    %46 = vector.shape_cast %45 : vector<16x128xf32> to vector<1x16x128xf32>
    %cst_26 = arith.constant dense<0.000000e+00> : vector<1x128xf32>
    %47 = vector.multi_reduction <add>, %46, %cst_26 [1] : vector<1x16x128xf32> to vector<1x128xf32>
    %c0_27 = arith.constant 0 : index
    %c0_28 = arith.constant 0 : index
    %48 = vector.load %arg9[%c0_27, %c0_28] : memref<128x2xf32, #tpu.memory_space<vmem>>, vector<128x2xf32>
    %cst_29 = arith.constant dense<0.000000e+00> : vector<1x2xf32>
    %49 = tpu.matmul %47, %48, %cst_29 {dimension_numbers = #tpu.dot_dimension_numbers<[1], [0], [0], [1], [0, 0, 1, 1], [], []>} : vector<1x128xf32>, vector<128x2xf32>, vector<1x2xf32> -> vector<1x2xf32>
    %50 = vector.broadcast %41 : vector<1x1xf32> to vector<1x2xf32>
    %51 = arith.divf %49, %50 : vector<1x2xf32>
    %c0_30 = arith.constant 0 : index
    %c0_31 = arith.constant 0 : index
    %52 = vector.load %arg10[%c0_30, %c0_31] : memref<1x2xf32, #tpu.memory_space<vmem>>, vector<1x2xf32>
    %53 = arith.addf %51, %52 : vector<1x2xf32>
    %cst_32 = arith.constant dense<0.000000e+00> : vector<1xf32>
    %54 = vector.multi_reduction <add>, %53, %cst_32 [1] : vector<1x2xf32> to vector<1xf32>
    %55 = vector.shape_cast %54 : vector<1xf32> to vector<1x1xf32>
    %cst_33 = arith.constant 2.000000e+00 : f32
    %56 = vector.broadcast %cst_33 : f32 to vector<1x1xf32>
    %57 = arith.divf %55, %56 : vector<1x1xf32>
    %58 = vector.broadcast %57 : vector<1x1xf32> to vector<1x2xf32>
    %59 = arith.subf %53, %58 : vector<1x2xf32>
    %60 = arith.mulf %59, %59 : vector<1x2xf32>
    %cst_34 = arith.constant dense<0.000000e+00> : vector<1xf32>
    %61 = vector.multi_reduction <add>, %60, %cst_34 [1] : vector<1x2xf32> to vector<1xf32>
    %62 = vector.shape_cast %61 : vector<1xf32> to vector<1x1xf32>
    %cst_35 = arith.constant 2.000000e+00 : f32
    %63 = vector.broadcast %cst_35 : f32 to vector<1x1xf32>
    %64 = arith.divf %62, %63 : vector<1x1xf32>
    %65 = vector.broadcast %57 : vector<1x1xf32> to vector<1x2xf32>
    %66 = arith.subf %53, %65 : vector<1x2xf32>
    %cst_36 = arith.constant 9.99999974E-6 : f32
    %67 = vector.broadcast %cst_36 : f32 to vector<1x1xf32>
    %68 = arith.addf %64, %67 : vector<1x1xf32>
    %69 = math.rsqrt %68 : vector<1x1xf32>
    %70 = vector.broadcast %69 : vector<1x1xf32> to vector<1x2xf32>
    %71 = arith.mulf %66, %70 : vector<1x2xf32>
    %c0_37 = arith.constant 0 : index
    %c0_38 = arith.constant 0 : index
    %72 = vector.load %arg11[%c0_37, %c0_38] : memref<1x2xf32, #tpu.memory_space<vmem>>, vector<1x2xf32>
    %73 = arith.mulf %71, %72 : vector<1x2xf32>
    %c0_39 = arith.constant 0 : index
    %c0_40 = arith.constant 0 : index
    %74 = vector.load %arg12[%c0_39, %c0_40] : memref<1x2xf32, #tpu.memory_space<vmem>>, vector<1x2xf32>
    %75 = arith.addf %73, %74 : vector<1x2xf32>
    %cst_41 = arith.constant 0.000000e+00 : f32
    %76 = vector.broadcast %cst_41 : f32 to vector<1x2xf32>
    %77 = arith.maximumf %75, %76 : vector<1x2xf32>
    %c0_42 = arith.constant 0 : index
    %c0_43 = arith.constant 0 : index
    %78 = vector.load %arg13[%c0_42, %c0_43] : memref<2x128xf32, #tpu.memory_space<vmem>>, vector<2x128xf32>
    %cst_44 = arith.constant dense<0.000000e+00> : vector<1x128xf32>
    %79 = tpu.matmul %77, %78, %cst_44 {dimension_numbers = #tpu.dot_dimension_numbers<[1], [0], [0], [1], [0, 0, 1, 1], [], []>} : vector<1x2xf32>, vector<2x128xf32>, vector<1x128xf32> -> vector<1x128xf32>
    %c0_45 = arith.constant 0 : index
    %c0_46 = arith.constant 0 : index
    %80 = vector.load %arg14[%c0_45, %c0_46] : memref<1x128xf32, #tpu.memory_space<vmem>>, vector<1x128xf32>
    %81 = arith.addf %79, %80 : vector<1x128xf32>
    %82 = vector.shape_cast %81 : vector<1x128xf32> to vector<1x1x128xf32>
    %83 = vector.broadcast %82 : vector<1x1x128xf32> to vector<1x16x128xf32>
    %84 = arith.addf %30, %83 : vector<1x16x128xf32>
    %85 = vector.shape_cast %84 : vector<1x16x128xf32> to vector<16x128xf32>
    %c1_i32_47 = arith.constant 1 : i32
    %86 = tpu.dynamic_rotate %85 by %c1_i32_47 dim 0 : vector<16x128xf32>, i32 -> vector<16x128xf32>
    %cst_48 = arith.constant 0.000000e+00 : f32
    %87 = vector.broadcast %cst_48 : f32 to vector<16x128xf32>
    %88 = arith.select %5, %86, %87 : vector<16x128xi1>, vector<16x128xf32>
    %c15_i32_49 = arith.constant 15 : i32
    %89 = tpu.dynamic_rotate %85 by %c15_i32_49 dim 0 : vector<16x128xf32>, i32 -> vector<16x128xf32>
    %cst_50 = arith.constant 0.000000e+00 : f32
    %90 = vector.broadcast %cst_50 : f32 to vector<16x128xf32>
    %91 = arith.select %7, %89, %90 : vector<16x128xi1>, vector<16x128xf32>
    %c0_51 = arith.constant 0 : index
    %c0_52 = arith.constant 0 : index
    %92 = vector.load %arg16[%c0_51, %c0_52] : memref<128x128xf32, #tpu.memory_space<vmem>>, vector<128x128xf32>
    %cst_53 = arith.constant dense<0.000000e+00> : vector<16x128xf32>
    %93 = tpu.matmul %85, %92, %cst_53 {dimension_numbers = #tpu.dot_dimension_numbers<[1], [0], [0], [1], [0, 0, 1, 1], [], []>} : vector<16x128xf32>, vector<128x128xf32>, vector<16x128xf32> -> vector<16x128xf32>
    %c0_54 = arith.constant 0 : index
    %c0_55 = arith.constant 0 : index
    %94 = vector.load %arg15[%c0_54, %c0_55] : memref<128x128xf32, #tpu.memory_space<vmem>>, vector<128x128xf32>
    %cst_56 = arith.constant dense<0.000000e+00> : vector<16x128xf32>
    %95 = tpu.matmul %88, %94, %cst_56 {dimension_numbers = #tpu.dot_dimension_numbers<[1], [0], [0], [1], [0, 0, 1, 1], [], []>} : vector<16x128xf32>, vector<128x128xf32>, vector<16x128xf32> -> vector<16x128xf32>
    %96 = arith.addf %93, %95 : vector<16x128xf32>
    %c0_57 = arith.constant 0 : index
    %c0_58 = arith.constant 0 : index
    %97 = vector.load %arg17[%c0_57, %c0_58] : memref<128x128xf32, #tpu.memory_space<vmem>>, vector<128x128xf32>
    %cst_59 = arith.constant dense<0.000000e+00> : vector<16x128xf32>
    %98 = tpu.matmul %91, %97, %cst_59 {dimension_numbers = #tpu.dot_dimension_numbers<[1], [0], [0], [1], [0, 0, 1, 1], [], []>} : vector<16x128xf32>, vector<128x128xf32>, vector<16x128xf32> -> vector<16x128xf32>
    %99 = arith.addf %96, %98 : vector<16x128xf32>
    %c0_60 = arith.constant 0 : index
    %c0_61 = arith.constant 0 : index
    %100 = vector.load %arg18[%c0_60, %c0_61] : memref<1x128xf32, #tpu.memory_space<vmem>>, vector<1x128xf32>
    %101 = vector.broadcast %100 : vector<1x128xf32> to vector<16x128xf32>
    %102 = arith.mulf %99, %101 : vector<16x128xf32>
    %c0_62 = arith.constant 0 : index
    %c0_63 = arith.constant 0 : index
    %103 = vector.load %arg19[%c0_62, %c0_63] : memref<1x128xf32, #tpu.memory_space<vmem>>, vector<1x128xf32>
    %104 = vector.broadcast %103 : vector<1x128xf32> to vector<16x128xf32>
    %105 = arith.addf %102, %104 : vector<16x128xf32>
    %106 = vector.shape_cast %105 : vector<16x128xf32> to vector<1x16x128xf32>
    %cst_64 = arith.constant dense<0.000000e+00> : vector<1x128xf32>
    %107 = vector.multi_reduction <add>, %106, %cst_64 [1] : vector<1x16x128xf32> to vector<1x128xf32>
    %cst_65 = arith.constant 1.600000e+01 : f32
    %108 = vector.broadcast %cst_65 : f32 to vector<1x128xf32>
    %109 = arith.divf %107, %108 : vector<1x128xf32>
    %c0_66 = arith.constant 0 : index
    %c0_67 = arith.constant 0 : index
    %110 = vector.load %arg20[%c0_66, %c0_67] : memref<128x2xf32, #tpu.memory_space<vmem>>, vector<128x2xf32>
    %cst_68 = arith.constant dense<0.000000e+00> : vector<1x2xf32>
    %111 = tpu.matmul %109, %110, %cst_68 {dimension_numbers = #tpu.dot_dimension_numbers<[1], [0], [0], [1], [0, 0, 1, 1], [], []>} : vector<1x128xf32>, vector<128x2xf32>, vector<1x2xf32> -> vector<1x2xf32>
    %cst_69 = arith.constant 6.250000e-02 : f32
    %112 = vector.broadcast %cst_69 : f32 to vector<1x2xf32>
    %113 = arith.mulf %111, %112 : vector<1x2xf32>
    %cst_70 = arith.constant 0.000000e+00 : f32
    %114 = vector.broadcast %cst_70 : f32 to vector<1x2xf32>
    %115 = arith.maximumf %113, %114 : vector<1x2xf32>
    %c0_71 = arith.constant 0 : index
    %c0_72 = arith.constant 0 : index
    %116 = vector.load %arg21[%c0_71, %c0_72] : memref<2x128xf32, #tpu.memory_space<vmem>>, vector<2x128xf32>
    %cst_73 = arith.constant dense<0.000000e+00> : vector<1x128xf32>
    %117 = tpu.matmul %115, %116, %cst_73 {dimension_numbers = #tpu.dot_dimension_numbers<[1], [0], [0], [1], [0, 0, 1, 1], [], []>} : vector<1x2xf32>, vector<2x128xf32>, vector<1x128xf32> -> vector<1x128xf32>
    %118 = arith.negf %117 : vector<1x128xf32>
    %119 = math.exp %118 : vector<1x128xf32>
    %cst_74 = arith.constant 1.000000e+00 : f32
    %120 = vector.broadcast %cst_74 : f32 to vector<1x128xf32>
    %121 = arith.addf %120, %119 : vector<1x128xf32>
    %122 = arith.divf %120, %121 : vector<1x128xf32>
    %123 = vector.shape_cast %122 : vector<1x128xf32> to vector<1x1x128xf32>
    %124 = vector.broadcast %123 : vector<1x1x128xf32> to vector<1x16x128xf32>
    %125 = arith.mulf %106, %124 : vector<1x16x128xf32>
    %126 = arith.addf %125, %0 : vector<1x16x128xf32>
    %cst_75 = arith.constant 0.000000e+00 : f32
    %127 = vector.broadcast %cst_75 : f32 to vector<1x16x128xf32>
    %128 = arith.maximumf %126, %127 : vector<1x16x128xf32>
    %c0_76 = arith.constant 0 : index
    %c0_77 = arith.constant 0 : index
    %c0_78 = arith.constant 0 : index
    %129 = vector.load %arg22[%c0_76, %c0_77, %c0_78] : memref<1x16x128xf32, #tpu.memory_space<vmem>>, vector<1x16x128xf32>
    tpu.vector_store %arg22[%c0_76, %c0_77, %c0_78], %128 {strides = array<i32>} : memref<1x16x128xf32, #tpu.memory_space<vmem>>, vector<1x16x128xf32>,
    return
  }
  func.func @transform_0(%arg0: i32) -> (i32, i32, i32) {
    %c0_i32 = arith.constant 0 : i32
    %c0_i32_0 = arith.constant 0 : i32
    %c0_i32_1 = arith.constant 0 : i32
    return %arg0, %c0_i32, %c0_i32_0 : i32, i32, i32
  }
  func.func @transform_1(%arg0: i32) -> (i32, i32) {
    %c0_i32 = arith.constant 0 : i32
    %c0_i32_0 = arith.constant 0 : i32
    %c0_i32_1 = arith.constant 0 : i32
    return %c0_i32, %c0_i32_0 : i32, i32
  }
  func.func @transform_2(%arg0: i32) -> (i32, i32) {
    %c0_i32 = arith.constant 0 : i32
    %c0_i32_0 = arith.constant 0 : i32
    %c0_i32_1 = arith.constant 0 : i32
    return %c0_i32, %c0_i32_0 : i32, i32
  }
  func.func @transform_3(%arg0: i32) -> (i32, i32) {
    %c0_i32 = arith.constant 0 : i32
    %c0_i32_0 = arith.constant 0 : i32
    %c0_i32_1 = arith.constant 0 : i32
    return %c0_i32, %c0_i32_0 : i32, i32
  }
  func.func @transform_4(%arg0: i32) -> (i32, i32) {
    %c0_i32 = arith.constant 0 : i32
    %c0_i32_0 = arith.constant 0 : i32
    %c0_i32_1 = arith.constant 0 : i32
    return %c0_i32, %c0_i32_0 : i32, i32
  }
  func.func @transform_5(%arg0: i32) -> (i32, i32) {
    %c0_i32 = arith.constant 0 : i32
    %c0_i32_0 = arith.constant 0 : i32
    %c0_i32_1 = arith.constant 0 : i32
    return %c0_i32, %c0_i32_0 : i32, i32
  }
  func.func @transform_6(%arg0: i32) -> (i32, i32) {
    %c0_i32 = arith.constant 0 : i32
    %c0_i32_0 = arith.constant 0 : i32
    %c0_i32_1 = arith.constant 0 : i32
    return %c0_i32, %c0_i32_0 : i32, i32
  }
  func.func @transform_7(%arg0: i32) -> (i32, i32) {
    %c0_i32 = arith.constant 0 : i32
    %c0_i32_0 = arith.constant 0 : i32
    %c0_i32_1 = arith.constant 0 : i32
    return %c0_i32, %c0_i32_0 : i32, i32
  }
  func.func @transform_8(%arg0: i32) -> (i32, i32) {
    %c0_i32 = arith.constant 0 : i32
    %c0_i32_0 = arith.constant 0 : i32
    %c0_i32_1 = arith.constant 0 : i32
    return %c0_i32, %c0_i32_0 : i32, i32
  }
  func.func @transform_9(%arg0: i32) -> (i32, i32) {
    %c0_i32 = arith.constant 0 : i32
    %c0_i32_0 = arith.constant 0 : i32
    %c0_i32_1 = arith.constant 0 : i32
    return %c0_i32, %c0_i32_0 : i32, i32
  }
  func.func @transform_10(%arg0: i32) -> (i32, i32) {
    %c0_i32 = arith.constant 0 : i32
    %c0_i32_0 = arith.constant 0 : i32
    %c0_i32_1 = arith.constant 0 : i32
    return %c0_i32, %c0_i32_0 : i32, i32
  }
  func.func @transform_11(%arg0: i32) -> (i32, i32) {
    %c0_i32 = arith.constant 0 : i32
    %c0_i32_0 = arith.constant 0 : i32
    %c0_i32_1 = arith.constant 0 : i32
    return %c0_i32, %c0_i32_0 : i32, i32
  }
  func.func @transform_12(%arg0: i32) -> (i32, i32) {
    %c0_i32 = arith.constant 0 : i32
    %c0_i32_0 = arith.constant 0 : i32
    %c0_i32_1 = arith.constant 0 : i32
    return %c0_i32, %c0_i32_0 : i32, i32
  }
  func.func @transform_13(%arg0: i32) -> (i32, i32) {
    %c0_i32 = arith.constant 0 : i32
    %c0_i32_0 = arith.constant 0 : i32
    %c0_i32_1 = arith.constant 0 : i32
    return %c0_i32, %c0_i32_0 : i32, i32
  }
  func.func @transform_14(%arg0: i32) -> (i32, i32) {
    %c0_i32 = arith.constant 0 : i32
    %c0_i32_0 = arith.constant 0 : i32
    %c0_i32_1 = arith.constant 0 : i32
    return %c0_i32, %c0_i32_0 : i32, i32
  }
  func.func @transform_15(%arg0: i32) -> (i32, i32) {
    %c0_i32 = arith.constant 0 : i32
    %c0_i32_0 = arith.constant 0 : i32
    %c0_i32_1 = arith.constant 0 : i32
    return %c0_i32, %c0_i32_0 : i32, i32
  }
  func.func @transform_16(%arg0: i32) -> (i32, i32) {
    %c0_i32 = arith.constant 0 : i32
    %c0_i32_0 = arith.constant 0 : i32
    %c0_i32_1 = arith.constant 0 : i32
    return %c0_i32, %c0_i32_0 : i32, i32
  }
  func.func @transform_17(%arg0: i32) -> (i32, i32) {
    %c0_i32 = arith.constant 0 : i32
    %c0_i32_0 = arith.constant 0 : i32
    %c0_i32_1 = arith.constant 0 : i32
    return %c0_i32, %c0_i32_0 : i32, i32
  }
  func.func @transform_18(%arg0: i32) -> (i32, i32) {
    %c0_i32 = arith.constant 0 : i32
    %c0_i32_0 = arith.constant 0 : i32
    %c0_i32_1 = arith.constant 0 : i32
    return %c0_i32, %c0_i32_0 : i32, i32
  }
  func.func @transform_19(%arg0: i32) -> (i32, i32) {
    %c0_i32 = arith.constant 0 : i32
    %c0_i32_0 = arith.constant 0 : i32
    %c0_i32_1 = arith.constant 0 : i32
    return %c0_i32, %c0_i32_0 : i32, i32
  }
  func.func @transform_20(%arg0: i32) -> (i32, i32) {
    %c0_i32 = arith.constant 0 : i32
    %c0_i32_0 = arith.constant 0 : i32
    %c0_i32_1 = arith.constant 0 : i32
    return %c0_i32, %c0_i32_0 : i32, i32
  }
  func.func @transform_21(%arg0: i32) -> (i32, i32, i32) {
    %c0_i32 = arith.constant 0 : i32
    %c0_i32_0 = arith.constant 0 : i32
    %c0_i32_1 = arith.constant 0 : i32
    return %arg0, %c0_i32, %c0_i32_0 : i32, i32, i32
  }
}

</mosaic_0001>

<bundles_post_ra>
// kernel: dual_basic_block.1
= control target key start
LH: loop header
LB: loop body
LE: loop exit
PB: predicated region body
PF: predicated region fallthrough
CT: control target
= control target key end

     0   :  { %s3495_s0 = inlined_call_operand.vmem [shape: f32[2,16,128], index: 0, kind: input, shape index: {}]   ;;  %s3496_s1 = inlined_call_operand.vmem [shape: f32[128,128], index: 1, kind: input, shape index: {}]   ;;  %s3497_s2 = inlined_call_operand.vmem [shape: f32[128,128], index: 2, kind: input, shape index: {}]   ;;  %s3498_s3 = inlined_call_operand.vmem [shape: f32[128,128], index: 3, kind: input, shape index: {}]   ;;  %s3499_s4 = inlined_call_operand.vmem [shape: f32[1,128], index: 4, kind: input, shape index: {}]   ;;  %s3500_s5 = inlined_call_operand.vmem [shape: f32[1,128], index: 5, kind: input, shape index: {}]   ;;  %s3501_s6 = inlined_call_operand.vmem [shape: f32[128,16], index: 6, kind: input, shape index: {}]   ;;  %s3502_s7 = inlined_call_operand.vmem [shape: f32[16,128], index: 7, kind: input, shape index: {}]   ;;  %s3503_s8 = inlined_call_operand.vmem [shape: f32[128,2], index: 8, kind: input, shape index: {}]   ;;  %s3504_s9 = inlined_call_operand.vmem [shape: f32[1,2], index: 9, kind: input, shape index: {}]   ;;  %s3505_s10 = inlined_call_operand.vmem [shape: f32[1,2], index: 10, kind: input, shape index: {}]   ;;  %s3506_s11 = inlined_call_operand.vmem [shape: f32[1,2], index: 11, kind: input, shape index: {}]   ;;  %s3507_s12 = inlined_call_operand.vmem [shape: f32[2,128], index: 12, kind: input, shape index: {}]   ;;  %s3508_s13 = inlined_call_operand.vmem [shape: f32[1,128], index: 13, kind: input, shape index: {}]   ;;  %s3509_s14 = inlined_call_operand.vmem [shape: f32[128,128], index: 14, kind: input, shape index: {}]   ;;  %s3510_s15 = inlined_call_operand.vmem [shape: f32[128,128], index: 15, kind: input, shape index: {}]   ;;  %s3511_s16 = inlined_call_operand.vmem [shape: f32[128,128], index: 16, kind: input, shape index: {}]   ;;  %s3512_s17 = inlined_call_operand.vmem [shape: f32[1,128], index: 17, kind: input, shape index: {}]   ;;  %s3513_s18 = inlined_call_operand.vmem [shape: f32[1,128], index: 18, kind: input, shape index: {}]   ;;  %s3514_s19 = inlined_call_operand.vmem [shape: f32[128,2], index: 19, kind: input, shape index: {}]   ;;  %s3515_s20 = inlined_call_operand.vmem [shape: f32[2,128], index: 20, kind: input, shape index: {}]   ;;  %s3516_s21 = inlined_call_operand.vmem [shape: f32[2,16,128], index: 21, kind: output, shape index: {}]  }
   0x1   :  { %3522 = sst [smem:[#allocation2_spill]] %s3495_s0 }
   0x2   :  { %3523 = sst [smem:[#allocation3_spill]] %s3496_s1 }
   0x3   :  { %3524 = sst [smem:[#allocation4_spill]] %s3497_s2  ;;  %s2893_s2 = smov 0  }
   0x4   :  { %3525 = sst [smem:[#allocation5_spill]] %s3498_s3 }
   0x5   :  { %3526 = sst [smem:[#allocation6_spill]] %s3499_s4 }
   0x6   :  { %3527 = sst [smem:[#allocation7_spill]] %s3500_s5 }
   0x7 LB: > { %s1935_s25 = sadd.s32 4294967295, %s2778_s2   ;;  %p1939_p0 = scmp.ge.s32.totalorder %s2778_s2, 1  ;;  %s2778_s2 = sphi %s2893_s2, %s31_s2  }
   0x8   : > { %p587_p1 = scmp.lt.s32.totalorder %s2778_s2, 3 }
   0xa   : > { %p588_p2 = pnand %p1939_p0, %p587_p1 }
   0xb   : > { %s3528_s3 = sld [smem:[#allocation3_spill]] (!%p588_p2)  ;;  %p647_p3 = scmp.lt.s32.totalorder (!%p588_p2), %s1935_s25, 1  ;;  %v659_v3 = vlaneseq (!%p588_p2)  ;;  %vm1066_vm4 = vcmask (!%p588_p2), 130048   ;;  %vm2781_vm5 = vmmov (!%p588_p2), 0   ;;  %vm1277_vm6 = vcmask (!%p588_p2), 8192  }
   0xc   : > { %591 = sbr.rel (%p588_p2) target bundleno = 2464 (0x9a0), region = 104  ;;  %s3529_s4 = sld [smem:[#allocation2_spill]] (!%p588_p2)  ;;  %vm1303_vm7 = vcmask (!%p588_p2), 1041408   ;;  %vm1299_vm8 = vcmask (!%p588_p2), 15360  }
   0xd   : > { %v2921_v9 = vshrl.u32 (!%p588_p2), %v659_v3, 7  ;;  %s3530_s5 = sld [smem:[#allocation4_spill]] (!%p588_p2)  ;;  %s3531_s28 = sld [smem:[#allocation5_spill]] (!%p588_p2) }
   0xf   : > { %vm668_vm0 = vcmp.lt.s32.totalorder (!%p588_p2), %v2921_v9, 1  ;;  %vm662_vm1 = vcmp.ne.s32.totalorder (!%p588_p2), %v2921_v9, 0  ;;  %vm675_vm2 = vcmp.lt.s32.totalorder (!%p588_p2), %v2921_v9, 7 }
  0x11   : > { %v696_v0 = vld [vmem:[%s3528_s3] sm:$0xff] (!%p588_p2)  ;;  %v697_v1 = vld [vmem:[%s3528_s3 + $0x8] sm:$0xff] (!%p588_p2)  ;;  %v698_v2 = vld [vmem:[%s3528_s3 + $0x10] sm:$0xff] (!%p588_p2) }
  0x12   : > { %v2463_v4 = vpack.c.bf16 (!%p588_p2), %v697_v1, %v696_v0  ;;  %v699_v5 = vld [vmem:[%s3528_s3 + $0x18] sm:$0xff] (!%p588_p2)  ;;  %v700_v7 = vld [vmem:[%s3528_s3 + $0x20] sm:$0xff] (!%p588_p2)  ;;  %v701_v8 = vld [vmem:[%s3528_s3 + $0x28] sm:$0xff] (!%p588_p2) }
  0x13   : > { %v2467_v6 = vpack.c.bf16 %v699_v5, %v698_v2  ;;  %s3536_s25 = smov (!%p647_p3, %s1935_s25), 1  ;;  %v2471_v10 = vpack.c.bf16 %v701_v8, %v700_v7  ;;  %v702_v11 = vld [vmem:[%s3528_s3 + $0x30] sm:$0xff]  ;;  %v703_v12 = vld [vmem:[%s3528_s3 + $0x38] sm:$0xff]  ;;  %v704_v19 = vld [vmem:[%s3528_s3 + $0x40] sm:$0xff] }
  0x14   : > { %2464 = vmatprep.subr.bf16.mxu0 %v2463_v4  ;;  %s3520_s26 = sshll.u32 %s3536_s25, 4  ;;  %v2475_v17 = vpack.c.bf16 %v703_v12, %v702_v11  ;;  %v705_v20 = vld [vmem:[%s3528_s3 + $0x48] sm:$0xff]  ;;  %v706_v22 = vld [vmem:[%s3528_s3 + $0x50] sm:$0xff]  ;;  %v707_v23 = vld [vmem:[%s3528_s3 + $0x58] sm:$0xff] }
  0x15   : > { %2466 = vmatpush3.bf16.msra.mxu0 %v2463_v4  ;;  %s2932_s30 = scalar_lea.vmem %s3529_s4, %s3520_s26  ;;  %v2479_v21 = vpack.c.bf16 %v705_v20, %v704_v19  ;;  %v2483_v24 = vpack.c.bf16 %v707_v23, %v706_v22  ;;  %v708_v25 = vld [vmem:[%s3528_s3 + $0x60] sm:$0xff]  ;;  %v709_v26 = vld [vmem:[%s3528_s3 + $0x68] sm:$0xff]  ;;  %v710_v28 = vld [vmem:[%s3528_s3 + $0x70] sm:$0xff]  ;;  %v3087_v22 = vadd.s32 8, %v2921_v9  ;;  %s3532_s26 = sld [smem:[#allocation6_spill]] }
  0x16   : > { %2468 = vmatprep.subr.bf16.mxu0 %v2467_v6  ;;  %v2938_v13 = vld [vmem:[%s2932_s30] sm:$0xff]  ;;  %v2941_v14 = vld [vmem:[%s2932_s30 + $0x8] sm:$0xff]  ;;  %v2487_v27 = vpack.c.bf16 %v709_v26, %v708_v25  ;;  %v711_v29 = vld [vmem:[%s3528_s3 + $0x78] sm:$0xff]  ;;  %s3533_s3 = sld [smem:[#allocation7_spill]] }
  0x17   : > { %v666_v15 = vrot.slane %v2938_v13, 7  ;;  %v667_v16 = vrot.slane %v2941_v14, 7  ;;  %v2491_v30 = vpack.c.bf16 %v711_v29, %v710_v28  ;;  %v680_v31 = vld [vmem:[%s3530_s5] sm:$0xff]  ;;  %v681_v32 = vld [vmem:[%s3530_s5 + $0x8] sm:$0xff]  ;;  %v682_v34 = vld [vmem:[%s3530_s5 + $0x10] sm:$0xff]  ;;  %v673_v59 = vrot.slane %v2938_v13, 1 }
  0x18   : > { %v2495_v33 = vpack.c.bf16 %v681_v32, %v680_v31  ;;  %v683_v35 = vld [vmem:[%s3530_s5 + $0x18] sm:$0xff]  ;;  %v684_v38 = vld [vmem:[%s3530_s5 + $0x20] sm:$0xff]  ;;  %v685_v39 = vld [vmem:[%s3530_s5 + $0x28] sm:$0xff]  ;;  %v674_v60 = vrot.slane %v2941_v14, 1  ;;  %vm665_vm3 = vcmp.ne.s32.totalorder %v3087_v22, 15 }
  0x19   : > { %2470 = vmatpush3.bf16.msra.mxu0 %v2467_v6  ;;  %v670_v18 = vsel %vm668_vm0, %v667_v16, %v666_v15  ;;  %v669_v36 = vsel %vm668_vm0, %v666_v15, %v667_v16  ;;  %v2499_v37 = vpack.c.bf16 %v683_v35, %v682_v34  ;;  %v2503_v40 = vpack.c.bf16 %v685_v39, %v684_v38  ;;  %v686_v41 = vld [vmem:[%s3530_s5 + $0x30] sm:$0xff]  ;;  %v687_v42 = vld [vmem:[%s3530_s5 + $0x38] sm:$0xff]  ;;  %v688_v44 = vld [vmem:[%s3530_s5 + $0x40] sm:$0xff] }
  0x1a   : > { %2472 = vmatprep.subr.bf16.mxu0 %v2471_v10  ;;  %2163 = vmatprep.mubr.msk.f32.mxu0 %vm662_vm1, %v670_v18  ;;  %v2507_v43 = vpack.c.bf16 %v687_v42, %v686_v41  ;;  %v689_v45 = vld [vmem:[%s3530_s5 + $0x48] sm:$0xff]  ;;  %v690_v47 = vld [vmem:[%s3530_s5 + $0x50] sm:$0xff]  ;;  %v691_v48 = vld [vmem:[%s3530_s5 + $0x58] sm:$0xff]  ;;  %v676_v0 = vsel %vm675_vm2, %v673_v59, %v674_v60  ;;  %v677_v26 = vsel %vm675_vm2, %v674_v60, %v673_v59 }
  0x1b   : > { %v2511_v46 = vpack.c.bf16 %v689_v45, %v688_v44  ;;  %v2515_v49 = vpack.c.bf16 %v691_v48, %v690_v47  ;;  %v692_v50 = vld [vmem:[%s3530_s5 + $0x60] sm:$0xff]  ;;  %v693_v51 = vld [vmem:[%s3530_s5 + $0x68] sm:$0xff]  ;;  %v694_v53 = vld [vmem:[%s3530_s5 + $0x70] sm:$0xff] }
  0x1c   : > { %v2519_v52 = vpack.c.bf16 %v693_v51, %v692_v50  ;;  %v695_v54 = vld [vmem:[%s3530_s5 + $0x78] sm:$0xff]  ;;  %v862_v56 = vld [vmem:[%s3531_s28] sm:$0xff]  ;;  %v863_v57 = vld [vmem:[%s3531_s28 + $0x8] sm:$0xff] }
  0x1d   : > { %2474 = vmatpush3.bf16.msra.mxu0 %v2471_v10  ;;  %v2523_v55 = vpack.c.bf16 %v695_v54, %v694_v53  ;;  %v2527_v58 = vpack.c.bf16 %v863_v57, %v862_v56  ;;  %v864_v61 = vld [vmem:[%s3531_s28 + $0x10] sm:$0xff]  ;;  %v865_v62 = vld [vmem:[%s3531_s28 + $0x18] sm:$0xff]  ;;  %v866_v1 = vld [vmem:[%s3531_s28 + $0x20] sm:$0xff] }
  0x1e   : > { %2476 = vmatprep.subr.bf16.mxu0 %v2475_v17  ;;  %v2531_v63 = vpack.c.bf16 %v865_v62, %v864_v61  ;;  %v867_v2 = vld [vmem:[%s3531_s28 + $0x28] sm:$0xff]  ;;  %v868_v4 = vld [vmem:[%s3531_s28 + $0x30] sm:$0xff]  ;;  %v869_v5 = vld [vmem:[%s3531_s28 + $0x38] sm:$0xff] }
  0x1f   : > { %v2535_v3 = vpack.c.bf16 %v867_v2, %v866_v1  ;;  %v2539_v6 = vpack.c.bf16 %v869_v5, %v868_v4  ;;  %v870_v7 = vld [vmem:[%s3531_s28 + $0x40] sm:$0xff]  ;;  %v871_v8 = vld [vmem:[%s3531_s28 + $0x48] sm:$0xff]  ;;  %v872_v11 = vld [vmem:[%s3531_s28 + $0x50] sm:$0xff] }
  0x20   : > { %v2543_v10 = vpack.c.bf16 %v871_v8, %v870_v7  ;;  %v873_v12 = vld [vmem:[%s3531_s28 + $0x58] sm:$0xff]  ;;  %v875_v15 = vld [vmem:[%s3531_s28 + $0x68] sm:$0xff]  ;;  %v975_v20 = vld [vmem:[%s3501_s6] sm:$0xff] }
  0x21   : > { %2478 = vmatpush3.bf16.msra.mxu0 %v2475_v17  ;;  %v876_v17 = vld [vmem:[%s3531_s28 + $0x70] sm:$0xff]  ;;  %v877_v18 = vld [vmem:[%s3531_s28 + $0x78] sm:$0xff]  ;;  %v979_v28 = vld [vmem:[%s3501_s6 + $0x20] sm:$0xff] }
  0x22   : > { %2480 = vmatprep.subr.bf16.mxu0 %v2479_v21  ;;  %v2555_v19 = vpack.c.bf16 %v877_v18, %v876_v17  ;;  %v978_v25 = vld [vmem:[%s3501_s6 + $0x18] sm:$0xff]  ;;  %v980_v29 = vld [vmem:[%s3501_s6 + $0x28] sm:$0xff]  ;;  %v981_v31 = vld [vmem:[%s3501_s6 + $0x30] sm:$0xff] }
  0x23   : > { %v982_v32 = vld [vmem:[%s3501_s6 + $0x38] sm:$0xff]  ;;  %v983_v34 = vld [vmem:[%s3501_s6 + $0x40] sm:$0xff]  ;;  %v984_v35 = vld [vmem:[%s3501_s6 + $0x48] sm:$0xff] }
  0x24   : > { %v986_v38 = vld [vmem:[%s3501_s6 + $0x58] sm:$0xff]  ;;  %v988_v41 = vld [vmem:[%s3501_s6 + $0x68] sm:$0xff]  ;;  %v1947_v48 = vld [vmem:[%s3533_s3] ss:$0 sm:$0xff]  ;;  %s3534_s3 = sshll.u32 %s3536_s25, 4 }
  0x25   : > { %2482 = vmatpush3.bf16.msra.mxu0 %v2479_v21  ;;  %v976_v21 = vld [vmem:[%s3501_s6 + $0x8] sm:$0xff]  ;;  %v990_v44 = vld [vmem:[%s3501_s6 + $0x78] sm:$0xff]  ;;  %v1095_v61 = vld [vmem:[%s3502_s7] sm:$0xff]  ;;  %s656_s22 = scalar_lea.vmem %s3516_s21, %s3534_s3 }
  0x26   : > { %2484 = vmatprep.subr.bf16.mxu0 %v2483_v24  ;;  %v2559_v23 = vpack.c.bf16 %v976_v21, %v975_v20  ;;  %v1096_v62 = vld [vmem:[%s3502_s7 + $0x8] sm:$0xff]  ;;  %v1187_v17 = vld [vmem:[%s3503_s8] sm:$0xff]  ;;  %v2780_v20 = vmov 0.0|0.0  }
  0x27   : > { %v1188_v18 = vld [vmem:[%s3503_s8 + $0x8] sm:$0xff]  ;;  %v1705_v22 = vld [vmem:[%s3514_s19 + $0x40] sm:$0xff] }
  0x28   : > { %v2596_v21 = vpack.c.bf16 %v1188_v18, %v1187_v17 }
  0x29   : > { %2486 = vmatpush3.bf16.msra.mxu0 %v2483_v24  ;;  %v977_v24 = vld [vmem:[%s3501_s6 + $0x10] sm:$0xff] }
  0x2a   : > { %2488 = vmatprep.subr.bf16.mxu0 %v2487_v27 }
  0x2d   : > { %2490 = vmatpush3.bf16.msra.mxu0 %v2487_v27  ;;  %v2563_v27 = vpack.c.bf16 %v978_v25, %v977_v24  ;;  %v1191_v25 = vld [vmem:[%s3503_s8 + $0x20] sm:$0xff] }
  0x2e   : > { %2492 = vmatprep.subr.bf16.mxu0 %v2491_v30 }
  0x31   : > { %2494 = vmatpush3.bf16.msra.mxu0 %v2491_v30  ;;  %v2567_v30 = vpack.c.bf16 %v980_v29, %v979_v28  ;;  %v1193_v28 = vld [vmem:[%s3503_s8 + $0x30] sm:$0xff]  ;;  %v1194_v29 = vld [vmem:[%s3503_s8 + $0x38] sm:$0xff] }
  0x32   : > { %2496 = vmatprep.subr.bf16.mxu0 %v2495_v33 }
  0x34   : > { %2164 = vmatmul.mubr.f32.vlgmr.msra.gmra.mrb[0].mxu0 %v669_v36  ;;  %v2575_v36 = vpack.c.bf16 %v984_v35, %v983_v34  ;;  %v1197_v34 = vld [vmem:[%s3503_s8 + $0x50] sm:$0xff]  ;;  %v1198_v35 = vld [vmem:[%s3503_s8 + $0x58] sm:$0xff] }
  0x35   : > { %2498 = vmatpush3.bf16.msra.mxu0 %v2495_v33  ;;  %2198 = vmatprep.mubr.f32.mxu0 %v2938_v13  ;;  %v2547_v13 = vpack.c.bf16 %v873_v12, %v872_v11  ;;  %v2571_v33 = vpack.c.bf16 %v982_v32, %v981_v31  ;;  %v1195_v31 = vld [vmem:[%s3503_s8 + $0x40] sm:$0xff]  ;;  %v1196_v32 = vld [vmem:[%s3503_s8 + $0x48] sm:$0xff] }
  0x36   : > { %2500 = vmatprep.subr.bf16.mxu0 %v2499_v37 }
  0x39   : > { %2502 = vmatpush3.bf16.msra.mxu0 %v2499_v37  ;;  %v985_v37 = vld [vmem:[%s3501_s6 + $0x50] sm:$0xff] }
  0x3a   : > { %2504 = vmatprep.subr.bf16.mxu0 %v2503_v40  ;;  %v2579_v39 = vpack.c.bf16 %v986_v38, %v985_v37  ;;  %v1199_v37 = vld [vmem:[%s3503_s8 + $0x60] sm:$0xff]  ;;  %v1200_v38 = vld [vmem:[%s3503_s8 + $0x68] sm:$0xff] }
  0x3d   : > { %2506 = vmatpush3.bf16.msra.mxu0 %v2503_v40  ;;  %v987_v40 = vld [vmem:[%s3501_s6 + $0x60] sm:$0xff] }
  0x3e   : > { %2508 = vmatprep.subr.bf16.mxu0 %v2507_v43  ;;  %v2583_v42 = vpack.c.bf16 %v988_v41, %v987_v40  ;;  %v1201_v40 = vld [vmem:[%s3503_s8 + $0x70] sm:$0xff]  ;;  %v1202_v41 = vld [vmem:[%s3503_s8 + $0x78] sm:$0xff] }
  0x41   : > { %2510 = vmatpush3.bf16.msra.mxu0 %v2507_v43  ;;  %v989_v43 = vld [vmem:[%s3501_s6 + $0x70] sm:$0xff] }
  0x42   : > { %2512 = vmatprep.subr.bf16.mxu0 %v2511_v46  ;;  %v2587_v45 = vpack.c.bf16 %v990_v44, %v989_v43  ;;  %v2782_v43 = vmov 0.0  }
  0x45   : > { %2514 = vmatpush3.bf16.msra.mxu0 %v2511_v46  ;;  %v1946_v46 = vld [vmem:[%s3532_s26] ss:$0 sm:$0xff] }
  0x46   : > { %2516 = vmatprep.subr.bf16.mxu0 %v2515_v49 }
  0x49   : > { %2518 = vmatpush3.bf16.msra.mxu0 %v2515_v49 }
  0x4a   : > { %2520 = vmatprep.subr.bf16.mxu0 %v2519_v52 }
  0x4d   : > { %2522 = vmatpush3.bf16.msra.mxu0 %v2519_v52 }
  0x4e   : > { %2524 = vmatprep.subr.bf16.mxu0 %v2523_v55 }
  0x51   : > { %2526 = vmatpush3.bf16.msra.mxu0 %v2523_v55 }
  0x52   : > { %2528 = vmatprep.subr.bf16.mxu0 %v2527_v58 }
  0x54   : > { %2199 = vmatmul.mubr.f32.vlgmr.msra.gmra.mrb[0].mxu0 %v2941_v14  ;;  %v874_v14 = vld [vmem:[%s3531_s28 + $0x60] sm:$0xff] }
  0x55   : > { %2530 = vmatpush3.bf16.msra.mxu0 %v2527_v58  ;;  %2233 = vmatprep.mubr.f32.mxu0 %v676_v0  ;;  %v2551_v16 = vpack.c.bf16 %v875_v15, %v874_v14 }
  0x56   : > { %2532 = vmatprep.subr.bf16.mxu0 %v2531_v63 }
  0x59   : > { %2534 = vmatpush3.bf16.msra.mxu0 %v2531_v63  ;;  %v2591_v63 = vpack.c.bf16 %v1096_v62, %v1095_v61 }
  0x5a   : > { %2536 = vmatprep.subr.bf16.mxu0 %v2535_v3 }
  0x5b   : > { %2592 = vmatprep.subr.bf16.mxu1 %v2591_v63 }
  0x5c   : > { %2594 = vmatpush3.bf16.msra.mxu1 %v2591_v63 }
  0x5d   : > { %2538 = vmatpush3.bf16.msra.mxu0 %v2535_v3  ;;  %2595 = vmatprep.subr.bf16.mxu1 %v2780_v20 }
  0x5e   : > { %2540 = vmatprep.subr.bf16.mxu0 %v2539_v6 }
  0x61   : > { %2542 = vmatpush3.bf16.msra.mxu0 %v2539_v6 }
  0x62   : > { %2544 = vmatprep.subr.bf16.mxu0 %v2543_v10 }
  0x65   : > { %2546 = vmatpush3.bf16.msra.mxu0 %v2543_v10 }
  0x66   : > { %2548 = vmatprep.subr.bf16.mxu0 %v2547_v13 }
  0x69   : > { %2550 = vmatpush3.bf16.msra.mxu0 %v2547_v13 }
  0x6a   : > { %2552 = vmatprep.subr.bf16.mxu0 %v2551_v16 }
  0x6d   : > { %2554 = vmatpush3.bf16.msra.mxu0 %v2551_v16 }
  0x6e   : > { %2556 = vmatprep.subr.bf16.mxu0 %v2555_v19 }
  0x71   : > { %2558 = vmatpush3.bf16.msra.mxu0 %v2555_v19  ;;  %v1189_v19 = vld [vmem:[%s3503_s8 + $0x10] sm:$0xff] }
  0x72   : > { %2560 = vmatprep.subr.bf16.mxu0 %v2559_v23 }
  0x74   : > { %2234 = vmatmul.mubr.msk.f32.vlgmr.msra.gmra.mrb[0].mxu0 %vm665_vm3, %v677_v26  ;;  %v1192_v26 = vld [vmem:[%s3503_s8 + $0x28] sm:$0xff] }
  0x75   : > { %2562 = vmatpush3.bf16.msra.mxu0 %v2559_v23  ;;  %v1190_v23 = vld [vmem:[%s3503_s8 + $0x18] sm:$0xff] }
  0x76   : > { %2564 = vmatprep.subr.bf16.mxu0 %v2563_v27  ;;  %v2599_v24 = vpack.c.bf16 %v1190_v23, %v1189_v19  ;;  %v1292_v23 = vld [vmem:[%s3505_s10] sm:$0x1] }
  0x79   : > { %2566 = vmatpush3.bf16.msra.mxu0 %v2563_v27  ;;  %v2602_v27 = vpack.c.bf16 %v1192_v26, %v1191_v25  ;;  %v1294_v25 = vld [vmem:[%s3506_s11] sm:$0x1] }
  0x7a   : > { %2568 = vmatprep.subr.bf16.mxu0 %v2567_v30 }
  0x7d   : > { %2570 = vmatpush3.bf16.msra.mxu0 %v2567_v30  ;;  %v2605_v30 = vpack.c.bf16 %v1194_v29, %v1193_v28  ;;  %v1414_v28 = vld [vmem:[%s3509_s14 + $0x18] sm:$0xff] }
  0x7e   : > { %2572 = vmatprep.subr.bf16.mxu0 %v2571_v33 }
  0x81   : > { %2574 = vmatpush3.bf16.msra.mxu0 %v2571_v33  ;;  %v2608_v33 = vpack.c.bf16 %v1196_v32, %v1195_v31  ;;  %v1415_v32 = vld [vmem:[%s3509_s14 + $0x20] sm:$0xff] }
  0x82   : > { %2576 = vmatprep.subr.bf16.mxu0 %v2575_v36 }
  0x85   : > { %2578 = vmatpush3.bf16.msra.mxu0 %v2575_v36  ;;  %v2611_v36 = vpack.c.bf16 %v1198_v35, %v1197_v34  ;;  %v1417_v35 = vld [vmem:[%s3509_s14 + $0x30] sm:$0xff] }
  0x86   : > { %2580 = vmatprep.subr.bf16.mxu0 %v2579_v39 }
  0x89   : > { %2582 = vmatpush3.bf16.msra.mxu0 %v2579_v39  ;;  %v2614_v39 = vpack.c.bf16 %v1200_v38, %v1199_v37  ;;  %v1419_v38 = vld [vmem:[%s3509_s14 + $0x40] sm:$0xff] }
  0x8a   : > { %2584 = vmatprep.subr.bf16.mxu0 %v2583_v42 }
  0x8d   : > { %2586 = vmatpush3.bf16.msra.mxu0 %v2583_v42  ;;  %v2617_v42 = vpack.c.bf16 %v1202_v41, %v1201_v40  ;;  %v1421_v41 = vld [vmem:[%s3509_s14 + $0x50] sm:$0xff] }
  0x8e   : > { %2588 = vmatprep.subr.bf16.mxu0 %v2587_v45 }
  0x91   : > { %2590 = vmatpush3.bf16.msra.mxu0 %v2587_v45 }
  0x92   : > { %2715 = vmatprep.subr.bf16.mxu0 %v2780_v20 }
 0x147   : > { %v2235_v47 = vpop.f32.mrb[0].mxu0 }
 0x148   : > { %v963_v49 = vmul.f32 %v2235_v47, %v1946_v46  ;;  %v944_v50 = vpop.f32.mrb[1].mxu0 }
 0x149   : > { %v962_v51 = vmul.f32 %v1946_v46, %v944_v50 }
 0x14a   : > { %v972_v52 = vadd.f32 %v1947_v48, %v963_v49 }
 0x14b   : > { %v971_v53 = vadd.f32 %v1947_v48, %v962_v51 }
 0x14c   : > { %v3144_v55 = vmax.f32 %v972_v52, 0.0 }
 0x14d   : > { %v3142_v54 = vmax.f32 %v971_v53, 0.0 }
 0x14f   : > { %2268 = vmatprep.mubr.f32.mxu0 %v3142_v54 }
 0x150   : > { %2269 = vmatmul.mubr.f32.vlgmr.msra.gmra.mrb[2].mxu0 %v3144_v55 }
 0x151   : > { %2455 = vmatprep.mubr.msk.f32.mxu0 %vm2781_vm5, %v2782_v43 }
 0x223   : > { %v2270_v56 = vpop.f32.mrb[2].mxu0 }
 0x224   : > { %v1057_v57 = vpop.f32.mrb[3].mxu0  ;;  %v1068_v58 = vsel %vm1066_vm4, %v2270_v56, -inf }
 0x225   : > { %v1067_v59 = vsel %vm1066_vm4, %v1057_v57, -inf }
 0x226   : > { %v1069_v60 = vmax.f32 %v1067_v59, %v1068_v58 }
 0x228   : > { %1070 = vmax.xlane.f32.xlu0 %v1069_v60 }
 0x2b5   : > { %v1071_v0 = vpop.xlane.xlu0 %1070 }
 0x2b6   : > { %v1072_v1 = vrot.slane %v1071_v0, 4 }
 0x2b8   : > { %v1073_v2 = vmax.f32 %v1071_v0, %v1072_v1 }
 0x2ba   : > { %v1074_v3 = vrot.slane %v1073_v2, 2 }
 0x2bc   : > { %v1075_v4 = vmax.f32 %v1073_v2, %v1074_v3  ;;  %v1275_v2 = vld [vmem:[%s3504_s9] sm:$0x1] }
 0x2be   : > { %v1076_v5 = vrot.slane %v1075_v4, 1 }
 0x2c0   : > { %v1077_v6 = vmax.f32 %v1075_v4, %v1076_v5 }
 0x2c2   : > { %v1078_v7 = vsub.f32 %v1057_v57, %v1077_v6  ;;  %v1079_v8 = vsub.f32 %v2270_v56, %v1077_v6 }
 0x2c4   : > { %v1080_v10 = vmul.f32 1.442695, %v1078_v7  ;;  %v1082_v11 = vmul.f32 1.442695, %v1079_v8 }
 0x2c6   : > { %2758 = vpow2.f32 %v1080_v10 }
 0x2c7   : > { %2760 = vpow2.f32 %v1082_v11 }
 0x2d0   : > { %v2759_v12 = vpop.eup %2758 }
 0x2d1   : > { %v2761_v13 = vpop.eup %2760  ;;  %2275 = vmatprep.mubr.msk.f32.mxu1 %vm1066_vm4, %v2759_v12  ;;  %v1084_v14 = vsel %vm1066_vm4, %v2759_v12, 0.0 }
 0x2d2   : > { %2276 = vmatmul.mubr.msk.f32.vlgmr.msra.gmra.mrb[0].mxu1 %vm1066_vm4, %v2761_v13  ;;  %v1085_v15 = vsel %vm1066_vm4, %v2761_v13, 0.0  ;;  %v1297_v13 = vld [vmem:[%s3507_s12] sm:$0x3] }
 0x2d3   : > { %v1086_v16 = vadd.f32 %v1085_v15, %v1084_v14  ;;  %2597 = vmatpush3.bf16.msra.mxu1 %v2596_v21  ;;  %2310 = vmatprep.mubr.msk.f32.mxu1 %vm2781_vm5, %v2782_v43  ;;  %v1411_v14 = vld [vmem:[%s3509_s14] sm:$0xff]  ;;  %v1412_v15 = vld [vmem:[%s3509_s14 + $0x8] sm:$0xff] }
 0x2d4   : > { %2598 = vmatprep.subr.bf16.mxu1 %v2780_v20 }
 0x2d5   : > { %1087 = vadd.xlane.f32.xlu0 %v1086_v16  ;;  %v2619_v16 = vpack.c.bf16 %v1412_v15, %v1411_v14  ;;  %v1399_v15 = vld [vmem:[%s3510_s15 + $0x20] sm:$0xff] }
 0x2d7   : > { %2600 = vmatpush3.bf16.msra.mxu1 %v2599_v24 }
 0x2d8   : > { %2601 = vmatprep.subr.bf16.mxu1 %v2780_v20 }
 0x2db   : > { %2603 = vmatpush3.bf16.msra.mxu1 %v2602_v27  ;;  %v1413_v27 = vld [vmem:[%s3509_s14 + $0x10] sm:$0xff] }
 0x2dc   : > { %2604 = vmatprep.subr.bf16.mxu1 %v2780_v20  ;;  %v2623_v31 = vpack.c.bf16 %v1414_v28, %v1413_v27  ;;  %v1406_v27 = vld [vmem:[%s3510_s15 + $0x58] sm:$0xff] }
 0x2df   : > { %2606 = vmatpush3.bf16.msra.mxu1 %v2605_v30 }
 0x2e0   : > { %2607 = vmatprep.subr.bf16.mxu1 %v2780_v20 }
 0x2e3   : > { %2609 = vmatpush3.bf16.msra.mxu1 %v2608_v33  ;;  %v1416_v33 = vld [vmem:[%s3509_s14 + $0x28] sm:$0xff] }
 0x2e4   : > { %2610 = vmatprep.subr.bf16.mxu1 %v2780_v20  ;;  %v2627_v34 = vpack.c.bf16 %v1416_v33, %v1415_v32  ;;  %v1409_v32 = vld [vmem:[%s3510_s15 + $0x70] sm:$0xff]  ;;  %v1410_v33 = vld [vmem:[%s3510_s15 + $0x78] sm:$0xff] }
 0x2e7   : > { %2612 = vmatpush3.bf16.msra.mxu1 %v2611_v36  ;;  %v1418_v36 = vld [vmem:[%s3509_s14 + $0x38] sm:$0xff] }
 0x2e8   : > { %2613 = vmatprep.subr.bf16.mxu1 %v2780_v20  ;;  %v2631_v37 = vpack.c.bf16 %v1418_v36, %v1417_v35  ;;  %v1577_v35 = vld [vmem:[%s3511_s16] sm:$0xff]  ;;  %v1578_v36 = vld [vmem:[%s3511_s16 + $0x8] sm:$0xff] }
 0x2eb   : > { %2615 = vmatpush3.bf16.msra.mxu1 %v2614_v39  ;;  %v1420_v39 = vld [vmem:[%s3509_s14 + $0x48] sm:$0xff] }
 0x2ec   : > { %2616 = vmatprep.subr.bf16.mxu1 %v2780_v20  ;;  %v2635_v40 = vpack.c.bf16 %v1420_v39, %v1419_v38  ;;  %v1579_v38 = vld [vmem:[%s3511_s16 + $0x10] sm:$0xff]  ;;  %v1580_v39 = vld [vmem:[%s3511_s16 + $0x18] sm:$0xff] }
 0x2ef   : > { %2618 = vmatpush3.bf16.msra.mxu1 %v2617_v42  ;;  %v1422_v42 = vld [vmem:[%s3509_s14 + $0x58] sm:$0xff] }
 0x2f0   : > { %2313 = vmatprep.subr.mxu1 %v2782_v43 }
 0x362   : > { %v1088_v57 = vpop.xlane.xlu0 %1087 }
 0x363   : > { %v1089_v58 = vrot.slane %v1088_v57, 4 }
 0x365   : > { %v1090_v59 = vadd.f32 %v1089_v58, %v1088_v57  ;;  %v1698_v57 = vld [vmem:[%s3514_s19 + $0x8] sm:$0xff]  ;;  %v1699_v58 = vld [vmem:[%s3514_s19 + $0x10] sm:$0xff] }
 0x367   : > { %v1091_v60 = vrot.slane %v1090_v59, 2 }
 0x369   : > { %v1092_v61 = vadd.f32 %v1091_v60, %v1090_v59  ;;  %v1700_v60 = vld [vmem:[%s3514_s19 + $0x18] sm:$0xff] }
 0x36b   : > { %v1093_v62 = vrot.slane %v1092_v61, 1 }
 0x36d   : > { %v1094_v63 = vadd.f32 %v1093_v62, %v1092_v61  ;;  %v2719_v61 = vpack.c.bf16 %v1700_v60, %v1699_v58  ;;  %v1701_v62 = vld [vmem:[%s3514_s19 + $0x20] sm:$0xff]  ;;  %v1590_v60 = vld [vmem:[%s3511_s16 + $0x68] sm:$0xff] }
 0x36f   : > { %2762 = vrcp.f32 %v1094_v63  ;;  %v1702_v63 = vld [vmem:[%s3514_s19 + $0x28] sm:$0xff] }
 0x379   : > { %v2763_v0 = vpop.eup %2762 }
 0x3a5   : > { %v2277_v44 = vpop.f32.mrb[0].mxu1 }
 0x3a6   : > { %v1179_v45 = vmul.f32 %v2277_v44, %v3144_v55  ;;  %v1169_v46 = vpop.f32.mrb[1].mxu1  ;;  %v2639_v44 = vpack.c.bf16 %v1422_v42, %v1421_v41  ;;  %v2687_v42 = vpack.c.bf16 %v1580_v39, %v1579_v38 }
 0x3a7   : > { %v1178_v47 = vmul.f32 %v1169_v46, %v3142_v54  ;;  %v1424_v46 = vld [vmem:[%s3509_s14 + $0x68] sm:$0xff] }
 0x3a9   : > { %v1180_v48 = vadd.f32 %v1179_v45, %v1178_v47  ;;  %v1423_v45 = vld [vmem:[%s3509_s14 + $0x60] sm:$0xff] }
 0x3aa   : > { %v2643_v47 = vpack.c.bf16 %v1424_v46, %v1423_v45  ;;  %v1582_v45 = vld [vmem:[%s3511_s16 + $0x28] sm:$0xff] }
 0x3ab   : > { %v1181_v49 = vrot.slane %v1180_v48, 4 }
 0x3ad   : > { %v1182_v50 = vadd.f32 %v1181_v49, %v1180_v48  ;;  %v1425_v48 = vld [vmem:[%s3509_s14 + $0x70] sm:$0xff]  ;;  %v1426_v49 = vld [vmem:[%s3509_s14 + $0x78] sm:$0xff] }
 0x3af   : > { %v1183_v51 = vrot.slane %v1182_v50, 2 }
 0x3b1   : > { %v1184_v52 = vadd.f32 %v1183_v51, %v1182_v50  ;;  %v2647_v50 = vpack.c.bf16 %v1426_v49, %v1425_v48  ;;  %v1395_v51 = vld [vmem:[%s3510_s15] sm:$0xff]  ;;  %v1583_v48 = vld [vmem:[%s3511_s16 + $0x30] sm:$0xff]  ;;  %v1584_v49 = vld [vmem:[%s3511_s16 + $0x38] sm:$0xff] }
 0x3b3   : > { %v1185_v53 = vrot.slane %v1184_v52, 1 }
 0x3b5   : > { %v1186_v56 = vadd.f32 %v1185_v53, %v1184_v52  ;;  %v1396_v52 = vld [vmem:[%s3510_s15 + $0x8] sm:$0xff] }
 0x3b6   : > { %v2651_v53 = vpack.c.bf16 %v1396_v52, %v1395_v51  ;;  %v1585_v51 = vld [vmem:[%s3511_s16 + $0x40] sm:$0xff]  ;;  %v1586_v52 = vld [vmem:[%s3511_s16 + $0x48] sm:$0xff] }
 0x3b7   : > { %2311 = vmatmul.mubr.f32.vlgmr.msra.gmra.mrb[2].mxu1 %v1186_v56  ;;  %v1697_v56 = vld [vmem:[%s3514_s19] sm:$0xff] }
 0x3b8   : > { %2315 = vmatprep.mubr.msk.f32.mxu1 %vm2781_vm5, %v2782_v43  ;;  %2314 = vmatpush3.msk.msra.mxu1 %vm1303_vm7, %v1297_v13  ;;  %v2716_v59 = vpack.c.bf16 %v1698_v57, %v1697_v56  ;;  %v1587_v56 = vld [vmem:[%s3511_s16 + $0x50] sm:$0xff]  ;;  %v1588_v57 = vld [vmem:[%s3511_s16 + $0x58] sm:$0xff] }
 0x3b9   : > { %2620 = vmatprep.subr.bf16.mxu1 %v2619_v16  ;;  %v2703_v58 = vpack.c.bf16 %v1588_v57, %v1587_v56 }
 0x3ba   : > { %2717 = vmatpush3.bf16.msra.mxu0 %v2716_v59  ;;  %v1589_v59 = vld [vmem:[%s3511_s16 + $0x60] sm:$0xff] }
 0x3bb   : > { %2718 = vmatprep.subr.bf16.mxu0 %v2780_v20 }
 0x3be   : > { %2720 = vmatpush3.bf16.msra.mxu0 %v2719_v61  ;;  %v2707_v61 = vpack.c.bf16 %v1590_v60, %v1589_v59 }
 0x3bf   : > { %2721 = vmatprep.subr.bf16.mxu0 %v2780_v20 }
 0x48a   : > { %v1269_v1 = vpop.f32.mrb[2].mxu1 }
 0x48b   : > { %v1274_v3 = vmul.f32 %v2763_v0, %v1269_v1  ;;  %v2312_v4 = vpop.f32.mrb[3].mxu1  ;;  %v2722_v0 = vpack.c.bf16 %v1702_v63, %v1701_v62  ;;  %v1298_v1 = vld [vmem:[%s3508_s13] sm:$0x1]  ;;  %v1591_v62 = vld [vmem:[%s3511_s16 + $0x70] sm:$0xff]  ;;  %v1592_v63 = vld [vmem:[%s3511_s16 + $0x78] sm:$0xff] }
 0x48d   : > { %v1276_v5 = vadd.f32 %v1275_v2, %v1274_v3  ;;  %2723 = vmatpush3.bf16.msra.mxu0 %v2722_v0  ;;  %v1379_v2 = vsub.s32 0, %v2921_v9  ;;  %v2711_v0 = vpack.c.bf16 %v1592_v63, %v1591_v62 }
 0x48e   : > { %2724 = vmatprep.subr.bf16.mxu0 %v2780_v20 }
 0x48f   : > { %v1278_v6 = vsel %vm1277_vm6, %v1276_v5, 0.0 }
 0x490   : > { %1279 = vadd.xlane.f32.xlu1 %v1278_v6 }
 0x51d   : > { %v1280_v7 = vpop.xlane.xlu1 %1279 }
 0x51e   : > { %v1282_v8 = vmul.f32 0.5, %v1280_v7 }
 0x520   : > { %v1283_v10 = vsub.f32 %v1276_v5, %v1282_v8 }
 0x522   : > { %v1284_v11 = vmul.f32 %v1283_v10, %v1283_v10 }
 0x524   : > { %v1285_v12 = vsel %vm1277_vm6, %v1284_v11, 0.0  ;;  %v1398_v11 = vld [vmem:[%s3510_s15 + $0x18] sm:$0xff] }
 0x525   : > { %1286 = vadd.xlane.f32.xlu1 %v1285_v12 }
 0x5b2   : > { %v1287_v17 = vpop.xlane.xlu1 %1286 }
 0x5b3   : > { %v1288_v18 = vmul.f32 0.5, %v1287_v17 }
 0x5b5   : > { %v1289_v19 = vadd.f32 1e-05, %v1288_v18  ;;  %v1401_v18 = vld [vmem:[%s3510_s15 + $0x30] sm:$0xff] }
 0x5b7   : > { %2764 = vrsqrt.f32 %v1289_v19  ;;  %v1402_v19 = vld [vmem:[%s3510_s15 + $0x38] sm:$0xff] }
 0x5c1   : > { %v2765_v21 = vpop.eup %2764 }
 0x5c2   : > { %v1291_v24 = vmul.f32 %v2765_v21, %v1283_v10  ;;  %v1397_v10 = vld [vmem:[%s3510_s15 + $0x10] sm:$0xff]  ;;  %v2663_v21 = vpack.c.bf16 %v1402_v19, %v1401_v18 }
 0x5c4   : > { %v1293_v26 = vmul.f32 %v1292_v23, %v1291_v24  ;;  %v1403_v23 = vld [vmem:[%s3510_s15 + $0x40] sm:$0xff]  ;;  %v1404_v24 = vld [vmem:[%s3510_s15 + $0x48] sm:$0xff] }
 0x5c6   : > { %v1295_v29 = vadd.f32 %v1294_v25, %v1293_v26  ;;  %v2667_v25 = vpack.c.bf16 %v1404_v24, %v1403_v23  ;;  %v1405_v26 = vld [vmem:[%s3510_s15 + $0x50] sm:$0xff] }
 0x5c7   : > { %v2671_v28 = vpack.c.bf16 %v1406_v27, %v1405_v26 }
 0x5c8   : > { %v1296_v30 = vmax.f32 %v1295_v29, 0.0  ;;  %v1407_v29 = vld [vmem:[%s3510_s15 + $0x60] sm:$0xff] }
 0x5ca   : > { %2316 = vmatmul.mubr.msk.f32.vlgmr.msra.gmra.mrb[4].mxu1 %vm1299_vm8, %v1296_v30  ;;  %v1408_v30 = vld [vmem:[%s3510_s15 + $0x68] sm:$0xff] }
 0x5cb   : > { %2622 = vmatpush3.bf16.msra.mxu1 %v2619_v16  ;;  %v1400_v16 = vld [vmem:[%s3510_s15 + $0x28] sm:$0xff] }
 0x5cc   : > { %2624 = vmatprep.subr.bf16.mxu1 %v2623_v31  ;;  %v2659_v17 = vpack.c.bf16 %v1400_v16, %v1399_v15  ;;  %v1954_v15 = vld [vmem:[%s3512_s17] ss:$0 sm:$0xff] }
 0x5cf   : > { %2626 = vmatpush3.bf16.msra.mxu1 %v2623_v31  ;;  %v2675_v31 = vpack.c.bf16 %v1408_v30, %v1407_v29 }
 0x5d0   : > { %2628 = vmatprep.subr.bf16.mxu1 %v2627_v34 }
 0x5d3   : > { %2630 = vmatpush3.bf16.msra.mxu1 %v2627_v34  ;;  %v2679_v34 = vpack.c.bf16 %v1410_v33, %v1409_v32  ;;  %v1785_v32 = vld [vmem:[%s3515_s20] sm:$0x3] }
 0x5d4   : > { %2632 = vmatprep.subr.bf16.mxu1 %v2631_v37 }
 0x5d7   : > { %2634 = vmatpush3.bf16.msra.mxu1 %v2631_v37  ;;  %v2683_v37 = vpack.c.bf16 %v1578_v36, %v1577_v35 }
 0x5d8   : > { %2636 = vmatprep.subr.bf16.mxu1 %v2635_v40 }
 0x5db   : > { %2638 = vmatpush3.bf16.msra.mxu1 %v2635_v40 }
 0x5dc   : > { %2640 = vmatprep.subr.bf16.mxu1 %v2639_v44 }
 0x5df   : > { %2642 = vmatpush3.bf16.msra.mxu1 %v2639_v44  ;;  %v1581_v44 = vld [vmem:[%s3511_s16 + $0x20] sm:$0xff] }
 0x5e0   : > { %2644 = vmatprep.subr.bf16.mxu1 %v2643_v47 }
 0x5e3   : > { %2646 = vmatpush3.bf16.msra.mxu1 %v2643_v47  ;;  %v2691_v47 = vpack.c.bf16 %v1582_v45, %v1581_v44 }
 0x5e4   : > { %2648 = vmatprep.subr.bf16.mxu1 %v2647_v50 }
 0x5e7   : > { %2650 = vmatpush3.bf16.msra.mxu1 %v2647_v50  ;;  %v2695_v50 = vpack.c.bf16 %v1584_v49, %v1583_v48  ;;  %v2771_v49 = vld [vmem:[%s2932_s30 + $0x8] sm:$0xff] }
 0x5e8   : > { %2652 = vmatprep.subr.bf16.mxu1 %v2651_v53 }
 0x69d   : > { %v1373_v3 = vpop.f32.mrb[4].mxu1 }
 0x69e   : > { %v1374_v4 = vadd.f32 %v1373_v3, %v1298_v1  ;;  %v2317_v5 = vpop.f32.mrb[5].mxu1  ;;  %v1703_v3 = vld [vmem:[%s3514_s19 + $0x30] sm:$0xff] }
 0x6a0   : > { %v1380_v6 = vrot.slane %v1374_v4, %v1379_v2  ;;  %v1704_v4 = vld [vmem:[%s3514_s19 + $0x38] sm:$0xff] }
 0x6a1   : > { %v2725_v5 = vpack.c.bf16 %v1704_v4, %v1703_v3 }
 0x6a2   : > { %v3322_v7 = vadd.f32 %v1380_v6, %v3142_v54  ;;  %v3325_v8 = vadd.f32 %v1380_v6, %v3144_v55  ;;  %v2655_v55 = vpack.c.bf16 %v1398_v11, %v1397_v10  ;;  %v1709_v11 = vld [vmem:[%s3514_s19 + $0x60] sm:$0xff] }
 0x6a3   : > { %2726 = vmatpush3.bf16.msra.mxu0 %v2725_v5 }
 0x6a4   : > { %v1383_v12 = vrot.slane %v3322_v7, 7  ;;  %v1384_v13 = vrot.slane %v3325_v8, 7  ;;  %v1389_v40 = vrot.slane %v3322_v7, 1  ;;  %v1390_v41 = vrot.slane %v3325_v8, 1  ;;  %2727 = vmatprep.subr.bf16.mxu0 %v2780_v20 }
 0x6a6   : > { %v1386_v14 = vsel %vm668_vm0, %v1384_v13, %v1383_v12  ;;  %v1385_v54 = vsel %vm668_vm0, %v1383_v12, %v1384_v13  ;;  %v1391_v46 = vsel %vm675_vm2, %v1389_v40, %v1390_v41  ;;  %v1392_v1 = vsel %vm675_vm2, %v1390_v41, %v1389_v40  ;;  %v1710_v12 = vld [vmem:[%s3514_s19 + $0x68] sm:$0xff] }
 0x6a7   : > { %2350 = vmatprep.mubr.msk.f32.mxu1 %vm662_vm1, %v1386_v14  ;;  %v2734_v13 = vpack.c.bf16 %v1710_v12, %v1709_v11  ;;  %v1711_v14 = vld [vmem:[%s3514_s19 + $0x70] sm:$0xff] }
 0x6a8   : > { %2351 = vmatmul.mubr.f32.vlgmr.msra.gmra.mrb[6].mxu1 %v1385_v54  ;;  %v1712_v54 = vld [vmem:[%s3514_s19 + $0x78] sm:$0xff] }
 0x6a9   : > { %2654 = vmatpush3.bf16.msra.mxu1 %v2651_v53  ;;  %2385 = vmatprep.mubr.f32.mxu1 %v3322_v7  ;;  %v2699_v53 = vpack.c.bf16 %v1586_v52, %v1585_v51  ;;  %v1707_v7 = vld [vmem:[%s3514_s19 + $0x50] sm:$0xff] }
 0x6aa   : > { %2656 = vmatprep.subr.bf16.mxu1 %v2655_v55 }
 0x6ad   : > { %2658 = vmatpush3.bf16.msra.mxu1 %v2655_v55  ;;  %v2737_v55 = vpack.c.bf16 %v1712_v54, %v1711_v14 }
 0x6ae   : > { %2660 = vmatprep.subr.bf16.mxu1 %v2659_v17 }
 0x6b1   : > { %2662 = vmatpush3.bf16.msra.mxu1 %v2659_v17  ;;  %v1955_v17 = vld [vmem:[%s3513_s18] ss:$0 sm:$0xff] }
 0x6b2   : > { %2664 = vmatprep.subr.bf16.mxu1 %v2663_v21 }
 0x6b5   : > { %2666 = vmatpush3.bf16.msra.mxu1 %v2663_v21 }
 0x6b6   : > { %2668 = vmatprep.subr.bf16.mxu1 %v2667_v25 }
 0x6b9   : > { %2670 = vmatpush3.bf16.msra.mxu1 %v2667_v25 }
 0x6ba   : > { %2672 = vmatprep.subr.bf16.mxu1 %v2671_v28 }
 0x6bd   : > { %2674 = vmatpush3.bf16.msra.mxu1 %v2671_v28 }
 0x6be   : > { %2676 = vmatprep.subr.bf16.mxu1 %v2675_v31 }
 0x6c1   : > { %2678 = vmatpush3.bf16.msra.mxu1 %v2675_v31 }
 0x6c2   : > { %2680 = vmatprep.subr.bf16.mxu1 %v2679_v34 }
 0x6c5   : > { %2682 = vmatpush3.bf16.msra.mxu1 %v2679_v34 }
 0x6c6   : > { %2684 = vmatprep.subr.bf16.mxu1 %v2683_v37 }
 0x6c8   : > { %2386 = vmatmul.mubr.f32.vlgmr.msra.gmra.mrb[6].mxu1 %v3325_v8  ;;  %v1708_v8 = vld [vmem:[%s3514_s19 + $0x58] sm:$0xff] }
 0x6c9   : > { %2686 = vmatpush3.bf16.msra.mxu1 %v2683_v37  ;;  %2420 = vmatprep.mubr.f32.mxu1 %v1391_v46  ;;  %v2731_v10 = vpack.c.bf16 %v1708_v8, %v1707_v7 }
 0x6ca   : > { %2688 = vmatprep.subr.bf16.mxu1 %v2687_v42 }
 0x6cd   : > { %2690 = vmatpush3.bf16.msra.mxu1 %v2687_v42 }
 0x6ce   : > { %2692 = vmatprep.subr.bf16.mxu1 %v2691_v47 }
 0x6d1   : > { %2694 = vmatpush3.bf16.msra.mxu1 %v2691_v47  ;;  %v2770_v47 = vld [vmem:[%s2932_s30] sm:$0xff] }
 0x6d2   : > { %2696 = vmatprep.subr.bf16.mxu1 %v2695_v50 }
 0x6d5   : > { %2698 = vmatpush3.bf16.msra.mxu1 %v2695_v50 }
 0x6d6   : > { %2700 = vmatprep.subr.bf16.mxu1 %v2699_v53 }
 0x6d9   : > { %2702 = vmatpush3.bf16.msra.mxu1 %v2699_v53 }
 0x6da   : > { %2704 = vmatprep.subr.bf16.mxu1 %v2703_v58 }
 0x6dd   : > { %2706 = vmatpush3.bf16.msra.mxu1 %v2703_v58 }
 0x6de   : > { %2708 = vmatprep.subr.bf16.mxu1 %v2707_v61 }
 0x6e1   : > { %2710 = vmatpush3.bf16.msra.mxu1 %v2707_v61 }
 0x6e2   : > { %2712 = vmatprep.subr.bf16.mxu1 %v2711_v0 }
 0x6e5   : > { %2714 = vmatpush3.bf16.msra.mxu1 %v2711_v0 }
 0x6e6   : > { %2458 = vmatprep.subr.mxu1 %v2782_v43 }
 0x6e8   : > { %2421 = vmatmul.mubr.msk.f32.vlgmr.msra.gmra.mrb[6].mxu1 %vm665_vm3, %v1392_v1 }
 0x6e9   : > { %2460 = vmatprep.mubr.msk.f32.mxu1 %vm2781_vm5, %v2782_v43  ;;  %v1706_v43 = vld [vmem:[%s3514_s19 + $0x48] sm:$0xff]  ;;  %2459 = vmatpush3.msk.msra.mxu1 %vm1303_vm7, %v1785_v32 }
 0x6ea   : > { %v2728_v6 = vpack.c.bf16 %v1706_v43, %v1705_v22 }
 0x6ec   : > { %2729 = vmatpush3.bf16.msra.mxu0 %v2728_v6 }
 0x6ed   : > { %2730 = vmatprep.subr.bf16.mxu0 %v2780_v20 }
 0x6f0   : > { %2732 = vmatpush3.bf16.msra.mxu0 %v2731_v10 }
 0x6f1   : > { %2733 = vmatprep.subr.bf16.mxu0 %v2780_v20 }
 0x6f4   : > { %2735 = vmatpush3.bf16.msra.mxu0 %v2734_v13 }
 0x6f5   : > { %2736 = vmatprep.subr.bf16.mxu0 %v2780_v20 }
 0x6f8   : > { %2738 = vmatpush3.bf16.msra.mxu0 %v2737_v55 }
 0x7bb   : > { %v2422_v16 = vpop.f32.mrb[6].mxu1 }
 0x7bc   : > { %v1678_v18 = vmul.f32 %v2422_v16, %v1954_v15  ;;  %v1659_v19 = vpop.f32.mrb[7].mxu1 }
 0x7bd   : > { %v1677_v21 = vmul.f32 %v1954_v15, %v1659_v19 }
 0x7be   : > { %v1687_v23 = vadd.f32 %v1955_v17, %v1678_v18 }
 0x7bf   : > { %v1686_v24 = vadd.f32 %v1955_v17, %v1677_v21 }
 0x7c1   : > { %v1688_v25 = vadd.f32 %v1687_v23, %v1686_v24 }
 0x7c3   : > { %v1689_v26 = vrot.slane %v1688_v25, 4 }
 0x7c5   : > { %v1690_v27 = vadd.f32 %v1689_v26, %v1688_v25 }
 0x7c7   : > { %v1691_v28 = vrot.slane %v1690_v27, 2 }
 0x7c9   : > { %v1692_v20 = vadd.f32 %v1691_v28, %v1690_v27 }
 0x7cb   : > { %v1693_v29 = vrot.slane %v1692_v20, 1 }
 0x7cd   : > { %v1694_v30 = vadd.f32 %v1693_v29, %v1692_v20 }
 0x7cf   : > { %v1696_v31 = vmul.f32 0.0625, %v1694_v30 }
 0x7d1   : > { %2456 = vmatmul.mubr.f32.vlgmr.msra.gmra.mrb[4].mxu0 %v1696_v31 }
 0x8a4   : > { %v1779_v33 = vpop.f32.mrb[4].mxu0 }
 0x8a5   : > { %v1783_v34 = vmul.f32 0.0625, %v1779_v33  ;;  %v2457_v35 = vpop.f32.mrb[5].mxu0 }
 0x8a7   : > { %v1784_v36 = vmax.f32 %v1783_v34, 0.0 }
 0x8a9   : > { %2461 = vmatmul.mubr.msk.f32.vlgmr.msra.gmra.mrb[8].mxu1 %vm1299_vm8, %v1784_v36 }
 0x97c   : > { %v1858_v37 = vpop.f32.mrb[8].mxu1 }
 0x97d   : > { %v1958_v38 = vmul.f32 -1.442695, %v1858_v37  ;;  %v2462_v39 = vpop.f32.mrb[9].mxu1 }
 0x97f   : > { %2766 = vpow2.f32 %v1958_v38 }
 0x989   : > { %v2767_v40 = vpop.eup %2766 }
 0x98a   : > { %v1865_v41 = vadd.f32 1.0, %v2767_v40 }
 0x98c   : > { %2768 = vrcp.f32 %v1865_v41 }
 0x996   : > { %v2769_v42 = vpop.eup %2768 }
 0x997   : > { %v1871_v44 = vrot.slane %v2769_v42, %v1379_v2 }
 0x999   : > { %v1872_v45 = vmul.f32 %v1871_v44, %v1686_v24  ;;  %v1873_v46 = vmul.f32 %v1871_v44, %v1687_v23 }
 0x99b   : > { %v1874_v48 = vadd.f32 %v2770_v47, %v1872_v45  ;;  %v1875_v50 = vadd.f32 %v2771_v49, %v1873_v46 }
 0x99d   : > { %v1876_v51 = vmax.f32 %v1874_v48, 0.0  ;;  %v1877_v52 = vmax.f32 %v1875_v50, 0.0 }
 0x99f   : > { %1878 = vst [vmem:[%s656_s22] sm:$0xff] %v1876_v51  ;;  %1879 = vst [vmem:[%s656_s22 + $0x8] sm:$0xff] %v1877_v52 }
 0x9a0 PF: > { %s31_s2 = sadd.s32 1, %s2778_s2  }
 0x9a1   : > { %p28_p4 = scmp.ge.s32.totalorder %s31_s2, 4  }
 0x9a3   :  { %30 = sbr.rel (!%p28_p4) target bundleno = 7 (0x7), region = 134 }

</bundles_post_ra>
